<compile_context>
chip_gen: v6e
topology: v6e:2x2x1
jax: 0.10.0
libtpu: 0.0.40
codegen_flags: <defaults>
</compile_context>

<pallas_src>
import jax
import jax.numpy as jnp
from jax import lax
from jax.experimental import pallas as pl
from jax.experimental.pallas import tpu as pltpu


# Small synthetic architecture (the real module takes `architecture` as a constructor arg).
ARCHITECTURE = {
    "num_of_layers": 3,
    "input_channels": 2,
    "channels": [8, 16, 4],          # last entry = classes per head (dual head -> 8 output channels)
    "kernels": [3, 3, 1],
    "dilation": [1, 2, 1],
    "stride": [1, 1, 1],
    "batch_norm": [False, False, False],   # TODO(synk): batch-norm branch not exercised (all False here)
    "non_linearity": [True, True, True],   # ELU on hidden layers; softmax handled by the dual head
    "dropout": [0.0, 0.0, 0.0],            # TODO(synk): dropout=0 / eval mode -> identity
}


def _round_up(x, m):
    return (x + m - 1) // m * m


def _elu(x):
    # ELU(alpha=1). min() clamps the discarded positive branch so exp never produces inf.
    return jnp.where(x > 0, x, jnp.exp(jnp.minimum(x, 0.0)) - 1.0)


# ----------------------------- fused Pallas kernel -----------------------------

def _make_fused_kernel(arch, W, prod):
    """Build the fused per-batch-element kernel.

    Activation layout inside the kernel: (channels, flat_pixels) with the flattened
    pixel axis keeping the ORIGINAL row stride W (full-width rows); valid columns per
    row shrink with each VALID conv, invalid columns carry finite garbage that is
    cropped by the wrapper.
    """
    n = arch["num_of_layers"]
    ks, ds_ = arch["kernels"], arch["dilation"]
    nonlin = arch["non_linearity"]
    n_classes = arch["channels"][n - 1]
    n_hidden = n - 1

    def kernel(*refs):
        # refs: x, (w_l, b_l)*n_hidden, w_head, b_head, sm_out, lsm_out, act_scratch*n_hidden
        x_ref = refs[0]
        w_refs = [refs[1 + 2 * l] for l in range(n_hidden)]
        b_refs = [refs[2 + 2 * l] for l in range(n_hidden)]
        wh_ref = refs[1 + 2 * n_hidden]
        bh_ref = refs[2 + 2 * n_hidden]
        sm_ref = refs[3 + 2 * n_hidden]
        lsm_ref = refs[4 + 2 * n_hidden]
        act_refs = list(refs[5 + 2 * n_hidden:])

        def conv_taps(src_load, w_ref, k, d, n_cols):
            # Accumulate K*K shifted-slice matmuls: (Cout,Cin) @ (Cin, n_cols) in f32.
            acc = None
            t = 0
            for kh in range(k):
                for kw in range(k):
                    off = kh * d * W + kw * d
                    tap = src_load(off, n_cols)                       # (Cin, n_cols)
                    c = jnp.dot(w_ref[t], tap, preferred_element_type=jnp.float32)
                    acc = c if acc is None else acc + c
                    t += 1
            return acc

        # ---- hidden Basic2DCNNBlock layers: dilated conv + bias + ELU, kept in VMEM ----
        for l in range(n_hidden):
            if l == 0:
                src = lambda off, nc: x_ref[0, :, off:off + nc]
            else:
                prev = act_refs[l - 1]
                src = lambda off, nc, prev=prev: prev[:, off:off + nc]
            acc = conv_taps(src, w_refs[l], ks[l], ds_[l], prod[l]) + b_refs[l][...]
            if nonlin[l]:
                acc = _elu(acc)
            act_refs[l][...] = acc

        # ---- ConcatenateCNNBlock dual head: merged (2C, Cin) conv, per-head softmax ----
        last = act_refs[n_hidden - 1]
        logits = conv_taps(lambda off, nc: last[:, off:off + nc],
                           wh_ref, ks[n - 1], ds_[n - 1], prod[n - 1]) + bh_ref[...]

        sm_parts, lsm_parts = [], []
        for h in range(2):
            lg = logits[h * n_classes:(h + 1) * n_classes, :]         # (C, P) one head
            m = jnp.max(lg, axis=0, keepdims=True)                    # reduce over channels (sublanes)
            sh = lg - m
            e = jnp.exp(sh)
            s = jnp.sum(e, axis=0, keepdims=True)
            inv = pl.reciprocal(s, approx=True)                       # EUP, off the VALU
            sm_parts.append(e * inv)                                  # Softmax(dim=channels)
            lsm_parts.append(sh - jnp.log(s))                         # LogSoftmax(dim=channels)

        # single lane-dense store per output (last dim = OH*W)
        sm_ref[0] = jnp.concatenate(sm_parts, axis=0)
        lsm_ref[0] = jnp.concatenate(lsm_parts, axis=0)

    return kernel


# ----------------------------- wrapper -----------------------------

def build_fused_forward(arch, H, W):
    n = arch["num_of_layers"]
    ks, ds_, chs = arch["kernels"], arch["dilation"], arch["channels"]
    cin0 = arch["input_channels"]
    n_hidden = n - 1
    n_classes = chs[n - 1]

    assert all(s == 1 for s in arch["stride"]), "TODO(synk): stride != 1 not implemented"
    assert not any(arch["batch_norm"]), "TODO(synk): batch-norm branch not implemented (arch uses False)"

    # output spatial dims of the VALID dilated conv stack
    oh, ow = H, W
    for l in range(n):
        oh -= ds_[l] * (ks[l] - 1)
        ow -= ds_[l] * (ks[l] - 1)

    # Flattened (full-width, row stride W) column extents each stage must produce,
    # walking backwards from the head output.
    prod = [0] * n
    prod[n - 1] = oh * W
    for l in range(n - 2, -1, -1):
        prod[l] = prod[l + 1] + (ks[l + 1] - 1) * ds_[l + 1] * (W + 1)
    p_in = _round_up(prod[0] + (ks[0] - 1) * ds_[0] * (W + 1), 128)

    in_ch = [cin0] + chs[:n - 1]
    kernel = _make_fused_kernel(arch, W, prod)

    def forward(params, x_nchw):
        B = x_nchw.shape[0]
        # NCHW -> (B, Cin, H*W): pure reshape, NO transpose; zero-pad the flat pixel axis.
        x_flat = x_nchw.reshape(B, cin0, H * W)
        x_flat = jnp.pad(x_flat, ((0, 0), (0, 0), (0, p_in - H * W)))

        inputs = [x_flat]
        in_specs = [pl.BlockSpec((1, cin0, p_in), lambda b: (b, 0, 0))]

        # hidden-layer weights: per-tap (Cout, Cin) matrices, tap-major
        for l in range(n_hidden):
            k = ks[l]
            w_taps = jnp.transpose(params[f"w{l}"], (0, 1, 3, 2)).reshape(k * k, chs[l], in_ch[l])
            b_col = params[f"b{l}"].reshape(chs[l], 1)
            inputs += [w_taps, b_col]
            in_specs += [
                pl.BlockSpec(w_taps.shape, lambda b: (0, 0, 0)),
                pl.BlockSpec(b_col.shape, lambda b: (0, 0)),
            ]

        # dual head: merge the two heads into a single (k*k, 2C, Cin) weight / (2C,1) bias
        kh_ = ks[n - 1]
        w1 = jnp.transpose(params["head_w1"], (0, 1, 3, 2)).reshape(kh_ * kh_, n_classes, in_ch[n - 1])
        w2 = jnp.transpose(params["head_w2"], (0, 1, 3, 2)).reshape(kh_ * kh_, n_classes, in_ch[n - 1])
        wh = jnp.concatenate([w1, w2], axis=1)
        bh = jnp.concatenate([params["head_b1"], params["head_b2"]]).reshape(2 * n_classes, 1)
        inputs += [wh, bh]
        in_specs += [
            pl.BlockSpec(wh.shape, lambda b: (0, 0, 0)),
            pl.BlockSpec(bh.shape, lambda b: (0, 0)),
        ]

        out_cols = prod[n - 1]
        out_shape = (
            jax.ShapeDtypeStruct((B, 2 * n_classes, out_cols), jnp.float32),
            jax.ShapeDtypeStruct((B, 2 * n_classes, out_cols), jnp.float32),
        )
        out_specs = (
            pl.BlockSpec((1, 2 * n_classes, out_cols), lambda b: (b, 0, 0)),
            pl.BlockSpec((1, 2 * n_classes, out_cols), lambda b: (b, 0, 0)),
        )
        scratch = [pltpu.VMEM((chs[l], prod[l]), jnp.float32) for l in range(n_hidden)]

        sm_flat, lsm_flat = pl.pallas_call(
            kernel,
            out_shape=out_shape,
            grid=(B,),
            in_specs=in_specs,
            out_specs=out_specs,
            scratch_shapes=scratch,
            compiler_params=pltpu.CompilerParams(
                dimension_semantics=("parallel",),       # batch axis shards across v7x's 2 TCs
                vmem_limit_bytes=32 * 1024 * 1024,
            ),
        )(*inputs)

        # (B, 2C, oh*W) full-width rows -> crop the valid columns; already NCHW-ordered.
        sm = sm_flat.reshape(B, 2 * n_classes, oh, W)[:, :, :, :ow]
        lsm = lsm_flat.reshape(B, 2 * n_classes, oh, W)[:, :, :, :ow]
        return sm, lsm

    return forward


# ----------------------------- params + pure-JAX reference -----------------------------

def init_params(key, arch):
    params = {}
    n = arch["num_of_layers"]
    in_ch = arch["input_channels"]
    for l in range(n):
        k = arch["kernels"][l]
        out_ch = arch["channels"][l]
        std = (2.0 / (in_ch * k * k)) ** 0.5
        if l < n - 1:
            key, kw, kb = jax.random.split(key, 3)
            params[f"w{l}"] = std * jax.random.normal(kw, (k, k, in_ch, out_ch), jnp.float32)
            params[f"b{l}"] = 0.01 * jax.random.normal(kb, (out_ch,), jnp.float32)
        else:
            key, kw1, kb1, kw2, kb2 = jax.random.split(key, 5)
            params["head_w1"] = std * jax.random.normal(kw1, (k, k, in_ch, out_ch), jnp.float32)
            params["head_b1"] = 0.01 * jax.random.normal(kb1, (out_ch,), jnp.float32)
            params["head_w2"] = std * jax.random.normal(kw2, (k, k, in_ch, out_ch), jnp.float32)
            params["head_b2"] = 0.01 * jax.random.normal(kb2, (out_ch,), jnp.float32)
        in_ch = out_ch
    return params


def _ref_conv(x_nchw, w_hwio, b, dilation):
    y = lax.conv_general_dilated(
        x_nchw, w_hwio, window_strides=(1, 1), padding="VALID",
        rhs_dilation=(dilation, dilation),
        dimension_numbers=("NCHW", "HWIO", "NCHW"))
    return y + b.reshape(1, -1, 1, 1)


def ref_forward(params, x_nchw, arch):
    y = x_nchw
    n = arch["num_of_layers"]
    for l in range(n - 1):
        y = _ref_conv(y, params[f"w{l}"], params[f"b{l}"], arch["dilation"][l])
        y = jnp.where(y > 0, y, jnp.expm1(y))          # PyTorch ELU (alpha=1)
    d = arch["dilation"][n - 1]
    l1 = _ref_conv(y, params["head_w1"], params["head_b1"], d)
    l2 = _ref_conv(y, params["head_w2"], params["head_b2"], d)
    sm = jnp.concatenate([jax.nn.softmax(l1, axis=1), jax.nn.softmax(l2, axis=1)], axis=1)
    lsm = jnp.concatenate([jax.nn.log_softmax(l1, axis=1), jax.nn.log_softmax(l2, axis=1)], axis=1)
    return sm, lsm


# ----------------------------- main -----------------------------

if __name__ == "__main__":
    arch = ARCHITECTURE
    key = jax.random.PRNGKey(0)
    key, xkey = jax.random.split(key)
    B, H, W = 2, 16, 16
    x = jax.random.normal(xkey, (B, arch["input_channels"], H, W), jnp.float32)   # NCHW
    params = init_params(key, arch)

    forward = build_fused_forward(arch, H, W)
    fwd = jax.jit(forward)
    softmax_out, log_softmax_out = fwd(params, x)
    jax.block_until_ready((softmax_out, log_softmax_out))

    # 16 -> (k3,d1) 14 -> (k3,d2) 10 -> (k1) 10 ; dual head: 2*4 = 8 channels
    assert softmax_out.shape == (2, 8, 10, 10), softmax_out.shape
    assert log_softmax_out.shape == (2, 8, 10, 10), log_softmax_out.shape

    sm_ref, lsm_ref = ref_forward(params, x, arch)
    md_sm = float(jnp.max(jnp.abs(softmax_out - sm_ref)))
    md_lsm = float(jnp.max(jnp.abs(log_softmax_out - lsm_ref)))
    assert md_sm < 1e-2, ("softmax mismatch", md_sm)
    assert md_lsm < 1e-3, ("log_softmax mismatch", md_lsm)

    print("KERNEL_OK")
</pallas_src>

<mosaic_0001>
module attributes {stable_mosaic.version = 11 : i64} {
  func.func @kernel(%arg0: i32, %arg1: memref<1x2x384xf32, #tpu.memory_space<vmem>>, %arg2: memref<9x8x2xf32, #tpu.memory_space<vmem>>, %arg3: memref<8x1xf32, #tpu.memory_space<vmem>>, %arg4: memref<9x16x8xf32, #tpu.memory_space<vmem>>, %arg5: memref<16x1xf32, #tpu.memory_space<vmem>>, %arg6: memref<1x8x16xf32, #tpu.memory_space<vmem>>, %arg7: memref<8x1xf32, #tpu.memory_space<vmem>>, %arg8: memref<1x8x160xf32, #tpu.memory_space<vmem>>, %arg9: memref<1x8x160xf32, #tpu.memory_space<vmem>>, %arg10: memref<8x228xf32, #tpu.memory_space<vmem>>, %arg11: memref<16x160xf32, #tpu.memory_space<vmem>>) attributes {dimension_semantics = [#tpu.dimension_semantics<parallel>], iteration_bounds = array<i64: 2>, scalar_prefetch = 0 : i64, scratch_operands = 2 : i64, tpu.core_type = #tpu.core_type<tc>, window_params = [{transform_indices = @transform_0, window_bounds = array<i64: 1, 2, 384>}, {pipeline_mode = #tpu.pipeline_mode<synchronous>, transform_indices = @transform_1, window_bounds = array<i64: 9, 8, 2>}, {pipeline_mode = #tpu.pipeline_mode<synchronous>, transform_indices = @transform_2, window_bounds = array<i64: 8, 1>}, {pipeline_mode = #tpu.pipeline_mode<synchronous>, transform_indices = @transform_3, window_bounds = array<i64: 9, 16, 8>}, {pipeline_mode = #tpu.pipeline_mode<synchronous>, transform_indices = @transform_4, window_bounds = array<i64: 16, 1>}, {pipeline_mode = #tpu.pipeline_mode<synchronous>, transform_indices = @transform_5, window_bounds = array<i64: 1, 8, 16>}, {pipeline_mode = #tpu.pipeline_mode<synchronous>, transform_indices = @transform_6, window_bounds = array<i64: 8, 1>}, {transform_indices = @transform_7, window_bounds = array<i64: 1, 8, 160>}, {transform_indices = @transform_8, window_bounds = array<i64: 1, 8, 160>}]} {
    %c0 = arith.constant 0 : index
    %c0_0 = arith.constant 0 : index
    %c0_1 = arith.constant 0 : index
    %0 = vector.load %arg1[%c0, %c0_0, %c0_1] : memref<1x2x384xf32, #tpu.memory_space<vmem>>, vector<1x2x228xf32>
    %1 = vector.shape_cast %0 : vector<1x2x228xf32> to vector<2x228xf32>
    %c0_2 = arith.constant 0 : index
    %c0_3 = arith.constant 0 : index
    %c0_4 = arith.constant 0 : index
    %2 = vector.load %arg2[%c0_2, %c0_3, %c0_4] : memref<9x8x2xf32, #tpu.memory_space<vmem>>, vector<1x8x2xf32>
    %3 = vector.shape_cast %2 : vector<1x8x2xf32> to vector<8x2xf32>
    %cst = arith.constant dense<0.000000e+00> : vector<8x228xf32>
    %4 = tpu.matmul %3, %1, %cst {dimension_numbers = #tpu.dot_dimension_numbers<[1], [0], [0], [1], [0, 0, 1, 1], [], []>} : vector<8x2xf32>, vector<2x228xf32>, vector<8x228xf32> -> vector<8x228xf32>
    %c0_5 = arith.constant 0 : index
    %c0_6 = arith.constant 0 : index
    %c1 = arith.constant 1 : index
    %5 = vector.load %arg1[%c0_5, %c0_6, %c1] : memref<1x2x384xf32, #tpu.memory_space<vmem>>, vector<1x2x228xf32>
    %6 = vector.shape_cast %5 : vector<1x2x228xf32> to vector<2x228xf32>
    %c1_7 = arith.constant 1 : index
    %c0_8 = arith.constant 0 : index
    %c0_9 = arith.constant 0 : index
    %7 = vector.load %arg2[%c1_7, %c0_8, %c0_9] : memref<9x8x2xf32, #tpu.memory_space<vmem>>, vector<1x8x2xf32>
    %8 = vector.shape_cast %7 : vector<1x8x2xf32> to vector<8x2xf32>
    %cst_10 = arith.constant dense<0.000000e+00> : vector<8x228xf32>
    %9 = tpu.matmul %8, %6, %cst_10 {dimension_numbers = #tpu.dot_dimension_numbers<[1], [0], [0], [1], [0, 0, 1, 1], [], []>} : vector<8x2xf32>, vector<2x228xf32>, vector<8x228xf32> -> vector<8x228xf32>
    %10 = arith.addf %4, %9 : vector<8x228xf32>
    %c0_11 = arith.constant 0 : index
    %c0_12 = arith.constant 0 : index
    %c2 = arith.constant 2 : index
    %11 = vector.load %arg1[%c0_11, %c0_12, %c2] : memref<1x2x384xf32, #tpu.memory_space<vmem>>, vector<1x2x228xf32>
    %12 = vector.shape_cast %11 : vector<1x2x228xf32> to vector<2x228xf32>
    %c2_13 = arith.constant 2 : index
    %c0_14 = arith.constant 0 : index
    %c0_15 = arith.constant 0 : index
    %13 = vector.load %arg2[%c2_13, %c0_14, %c0_15] : memref<9x8x2xf32, #tpu.memory_space<vmem>>, vector<1x8x2xf32>
    %14 = vector.shape_cast %13 : vector<1x8x2xf32> to vector<8x2xf32>
    %cst_16 = arith.constant dense<0.000000e+00> : vector<8x228xf32>
    %15 = tpu.matmul %14, %12, %cst_16 {dimension_numbers = #tpu.dot_dimension_numbers<[1], [0], [0], [1], [0, 0, 1, 1], [], []>} : vector<8x2xf32>, vector<2x228xf32>, vector<8x228xf32> -> vector<8x228xf32>
    %16 = arith.addf %10, %15 : vector<8x228xf32>
    %c0_17 = arith.constant 0 : index
    %c0_18 = arith.constant 0 : index
    %c16 = arith.constant 16 : index
    %17 = vector.load %arg1[%c0_17, %c0_18, %c16] : memref<1x2x384xf32, #tpu.memory_space<vmem>>, vector<1x2x228xf32>
    %18 = vector.shape_cast %17 : vector<1x2x228xf32> to vector<2x228xf32>
    %c3 = arith.constant 3 : index
    %c0_19 = arith.constant 0 : index
    %c0_20 = arith.constant 0 : index
    %19 = vector.load %arg2[%c3, %c0_19, %c0_20] : memref<9x8x2xf32, #tpu.memory_space<vmem>>, vector<1x8x2xf32>
    %20 = vector.shape_cast %19 : vector<1x8x2xf32> to vector<8x2xf32>
    %cst_21 = arith.constant dense<0.000000e+00> : vector<8x228xf32>
    %21 = tpu.matmul %20, %18, %cst_21 {dimension_numbers = #tpu.dot_dimension_numbers<[1], [0], [0], [1], [0, 0, 1, 1], [], []>} : vector<8x2xf32>, vector<2x228xf32>, vector<8x228xf32> -> vector<8x228xf32>
    %22 = arith.addf %16, %21 : vector<8x228xf32>
    %c0_22 = arith.constant 0 : index
    %c0_23 = arith.constant 0 : index
    %c17 = arith.constant 17 : index
    %23 = vector.load %arg1[%c0_22, %c0_23, %c17] : memref<1x2x384xf32, #tpu.memory_space<vmem>>, vector<1x2x228xf32>
    %24 = vector.shape_cast %23 : vector<1x2x228xf32> to vector<2x228xf32>
    %c4 = arith.constant 4 : index
    %c0_24 = arith.constant 0 : index
    %c0_25 = arith.constant 0 : index
    %25 = vector.load %arg2[%c4, %c0_24, %c0_25] : memref<9x8x2xf32, #tpu.memory_space<vmem>>, vector<1x8x2xf32>
    %26 = vector.shape_cast %25 : vector<1x8x2xf32> to vector<8x2xf32>
    %cst_26 = arith.constant dense<0.000000e+00> : vector<8x228xf32>
    %27 = tpu.matmul %26, %24, %cst_26 {dimension_numbers = #tpu.dot_dimension_numbers<[1], [0], [0], [1], [0, 0, 1, 1], [], []>} : vector<8x2xf32>, vector<2x228xf32>, vector<8x228xf32> -> vector<8x228xf32>
    %28 = arith.addf %22, %27 : vector<8x228xf32>
    %c0_27 = arith.constant 0 : index
    %c0_28 = arith.constant 0 : index
    %c18 = arith.constant 18 : index
    %29 = vector.load %arg1[%c0_27, %c0_28, %c18] : memref<1x2x384xf32, #tpu.memory_space<vmem>>, vector<1x2x228xf32>
    %30 = vector.shape_cast %29 : vector<1x2x228xf32> to vector<2x228xf32>
    %c5 = arith.constant 5 : index
    %c0_29 = arith.constant 0 : index
    %c0_30 = arith.constant 0 : index
    %31 = vector.load %arg2[%c5, %c0_29, %c0_30] : memref<9x8x2xf32, #tpu.memory_space<vmem>>, vector<1x8x2xf32>
    %32 = vector.shape_cast %31 : vector<1x8x2xf32> to vector<8x2xf32>
    %cst_31 = arith.constant dense<0.000000e+00> : vector<8x228xf32>
    %33 = tpu.matmul %32, %30, %cst_31 {dimension_numbers = #tpu.dot_dimension_numbers<[1], [0], [0], [1], [0, 0, 1, 1], [], []>} : vector<8x2xf32>, vector<2x228xf32>, vector<8x228xf32> -> vector<8x228xf32>
    %34 = arith.addf %28, %33 : vector<8x228xf32>
    %c0_32 = arith.constant 0 : index
    %c0_33 = arith.constant 0 : index
    %c32 = arith.constant 32 : index
    %35 = vector.load %arg1[%c0_32, %c0_33, %c32] : memref<1x2x384xf32, #tpu.memory_space<vmem>>, vector<1x2x228xf32>
    %36 = vector.shape_cast %35 : vector<1x2x228xf32> to vector<2x228xf32>
    %c6 = arith.constant 6 : index
    %c0_34 = arith.constant 0 : index
    %c0_35 = arith.constant 0 : index
    %37 = vector.load %arg2[%c6, %c0_34, %c0_35] : memref<9x8x2xf32, #tpu.memory_space<vmem>>, vector<1x8x2xf32>
    %38 = vector.shape_cast %37 : vector<1x8x2xf32> to vector<8x2xf32>
    %cst_36 = arith.constant dense<0.000000e+00> : vector<8x228xf32>
    %39 = tpu.matmul %38, %36, %cst_36 {dimension_numbers = #tpu.dot_dimension_numbers<[1], [0], [0], [1], [0, 0, 1, 1], [], []>} : vector<8x2xf32>, vector<2x228xf32>, vector<8x228xf32> -> vector<8x228xf32>
    %40 = arith.addf %34, %39 : vector<8x228xf32>
    %c0_37 = arith.constant 0 : index
    %c0_38 = arith.constant 0 : index
    %c33 = arith.constant 33 : index
    %41 = vector.load %arg1[%c0_37, %c0_38, %c33] : memref<1x2x384xf32, #tpu.memory_space<vmem>>, vector<1x2x228xf32>
    %42 = vector.shape_cast %41 : vector<1x2x228xf32> to vector<2x228xf32>
    %c7 = arith.constant 7 : index
    %c0_39 = arith.constant 0 : index
    %c0_40 = arith.constant 0 : index
    %43 = vector.load %arg2[%c7, %c0_39, %c0_40] : memref<9x8x2xf32, #tpu.memory_space<vmem>>, vector<1x8x2xf32>
    %44 = vector.shape_cast %43 : vector<1x8x2xf32> to vector<8x2xf32>
    %cst_41 = arith.constant dense<0.000000e+00> : vector<8x228xf32>
    %45 = tpu.matmul %44, %42, %cst_41 {dimension_numbers = #tpu.dot_dimension_numbers<[1], [0], [0], [1], [0, 0, 1, 1], [], []>} : vector<8x2xf32>, vector<2x228xf32>, vector<8x228xf32> -> vector<8x228xf32>
    %46 = arith.addf %40, %45 : vector<8x228xf32>
    %c0_42 = arith.constant 0 : index
    %c0_43 = arith.constant 0 : index
    %c34 = arith.constant 34 : index
    %47 = vector.load %arg1[%c0_42, %c0_43, %c34] : memref<1x2x384xf32, #tpu.memory_space<vmem>>, vector<1x2x228xf32>
    %48 = vector.shape_cast %47 : vector<1x2x228xf32> to vector<2x228xf32>
    %c8 = arith.constant 8 : index
    %c0_44 = arith.constant 0 : index
    %c0_45 = arith.constant 0 : index
    %49 = vector.load %arg2[%c8, %c0_44, %c0_45] : memref<9x8x2xf32, #tpu.memory_space<vmem>>, vector<1x8x2xf32>
    %50 = vector.shape_cast %49 : vector<1x8x2xf32> to vector<8x2xf32>
    %cst_46 = arith.constant dense<0.000000e+00> : vector<8x228xf32>
    %51 = tpu.matmul %50, %48, %cst_46 {dimension_numbers = #tpu.dot_dimension_numbers<[1], [0], [0], [1], [0, 0, 1, 1], [], []>} : vector<8x2xf32>, vector<2x228xf32>, vector<8x228xf32> -> vector<8x228xf32>
    %52 = arith.addf %46, %51 : vector<8x228xf32>
    %c0_47 = arith.constant 0 : index
    %c0_48 = arith.constant 0 : index
    %53 = vector.load %arg3[%c0_47, %c0_48] : memref<8x1xf32, #tpu.memory_space<vmem>>, vector<8x1xf32>
    %54 = vector.broadcast %53 : vector<8x1xf32> to vector<8x228xf32>
    %55 = arith.addf %52, %54 : vector<8x228xf32>
    %cst_49 = arith.constant 0.000000e+00 : f32
    %56 = vector.broadcast %cst_49 : f32 to vector<8x228xf32>
    %57 = arith.cmpf ogt, %55, %56 : vector<8x228xf32>
    %cst_50 = arith.constant 0.000000e+00 : f32
    %58 = vector.broadcast %cst_50 : f32 to vector<8x228xf32>
    %59 = arith.minimumf %55, %58 : vector<8x228xf32>
    %60 = math.exp %59 : vector<8x228xf32>
    %cst_51 = arith.constant 1.000000e+00 : f32
    %61 = vector.broadcast %cst_51 : f32 to vector<8x228xf32>
    %62 = arith.subf %60, %61 : vector<8x228xf32>
    %63 = arith.select %57, %55, %62 : vector<8x228xi1>, vector<8x228xf32>
    %c0_52 = arith.constant 0 : index
    %c0_53 = arith.constant 0 : index
    %64 = vector.load %arg10[%c0_52, %c0_53] : memref<8x228xf32, #tpu.memory_space<vmem>>, vector<8x228xf32>
    tpu.vector_store %arg10[%c0_52, %c0_53], %63 {strides = array<i32>} : memref<8x228xf32, #tpu.memory_space<vmem>>, vector<8x228xf32>,
    %c0_54 = arith.constant 0 : index
    %c0_55 = arith.constant 0 : index
    %65 = vector.load %arg10[%c0_54, %c0_55] : memref<8x228xf32, #tpu.memory_space<vmem>>, vector<8x160xf32>
    %c0_56 = arith.constant 0 : index
    %c0_57 = arith.constant 0 : index
    %c0_58 = arith.constant 0 : index
    %66 = vector.load %arg4[%c0_56, %c0_57, %c0_58] : memref<9x16x8xf32, #tpu.memory_space<vmem>>, vector<1x16x8xf32>
    %67 = vector.shape_cast %66 : vector<1x16x8xf32> to vector<16x8xf32>
    %cst_59 = arith.constant dense<0.000000e+00> : vector<16x160xf32>
    %68 = tpu.matmul %67, %65, %cst_59 {dimension_numbers = #tpu.dot_dimension_numbers<[1], [0], [0], [1], [0, 0, 1, 1], [], []>} : vector<16x8xf32>, vector<8x160xf32>, vector<16x160xf32> -> vector<16x160xf32>
    %c0_60 = arith.constant 0 : index
    %c2_61 = arith.constant 2 : index
    %69 = vector.load %arg10[%c0_60, %c2_61] : memref<8x228xf32, #tpu.memory_space<vmem>>, vector<8x160xf32>
    %c1_62 = arith.constant 1 : index
    %c0_63 = arith.constant 0 : index
    %c0_64 = arith.constant 0 : index
    %70 = vector.load %arg4[%c1_62, %c0_63, %c0_64] : memref<9x16x8xf32, #tpu.memory_space<vmem>>, vector<1x16x8xf32>
    %71 = vector.shape_cast %70 : vector<1x16x8xf32> to vector<16x8xf32>
    %cst_65 = arith.constant dense<0.000000e+00> : vector<16x160xf32>
    %72 = tpu.matmul %71, %69, %cst_65 {dimension_numbers = #tpu.dot_dimension_numbers<[1], [0], [0], [1], [0, 0, 1, 1], [], []>} : vector<16x8xf32>, vector<8x160xf32>, vector<16x160xf32> -> vector<16x160xf32>
    %73 = arith.addf %68, %72 : vector<16x160xf32>
    %c0_66 = arith.constant 0 : index
    %c4_67 = arith.constant 4 : index
    %74 = vector.load %arg10[%c0_66, %c4_67] : memref<8x228xf32, #tpu.memory_space<vmem>>, vector<8x160xf32>
    %c2_68 = arith.constant 2 : index
    %c0_69 = arith.constant 0 : index
    %c0_70 = arith.constant 0 : index
    %75 = vector.load %arg4[%c2_68, %c0_69, %c0_70] : memref<9x16x8xf32, #tpu.memory_space<vmem>>, vector<1x16x8xf32>
    %76 = vector.shape_cast %75 : vector<1x16x8xf32> to vector<16x8xf32>
    %cst_71 = arith.constant dense<0.000000e+00> : vector<16x160xf32>
    %77 = tpu.matmul %76, %74, %cst_71 {dimension_numbers = #tpu.dot_dimension_numbers<[1], [0], [0], [1], [0, 0, 1, 1], [], []>} : vector<16x8xf32>, vector<8x160xf32>, vector<16x160xf32> -> vector<16x160xf32>
    %78 = arith.addf %73, %77 : vector<16x160xf32>
    %c0_72 = arith.constant 0 : index
    %c32_73 = arith.constant 32 : index
    %79 = vector.load %arg10[%c0_72, %c32_73] : memref<8x228xf32, #tpu.memory_space<vmem>>, vector<8x160xf32>
    %c3_74 = arith.constant 3 : index
    %c0_75 = arith.constant 0 : index
    %c0_76 = arith.constant 0 : index
    %80 = vector.load %arg4[%c3_74, %c0_75, %c0_76] : memref<9x16x8xf32, #tpu.memory_space<vmem>>, vector<1x16x8xf32>
    %81 = vector.shape_cast %80 : vector<1x16x8xf32> to vector<16x8xf32>
    %cst_77 = arith.constant dense<0.000000e+00> : vector<16x160xf32>
    %82 = tpu.matmul %81, %79, %cst_77 {dimension_numbers = #tpu.dot_dimension_numbers<[1], [0], [0], [1], [0, 0, 1, 1], [], []>} : vector<16x8xf32>, vector<8x160xf32>, vector<16x160xf32> -> vector<16x160xf32>
    %83 = arith.addf %78, %82 : vector<16x160xf32>
    %c0_78 = arith.constant 0 : index
    %c34_79 = arith.constant 34 : index
    %84 = vector.load %arg10[%c0_78, %c34_79] : memref<8x228xf32, #tpu.memory_space<vmem>>, vector<8x160xf32>
    %c4_80 = arith.constant 4 : index
    %c0_81 = arith.constant 0 : index
    %c0_82 = arith.constant 0 : index
    %85 = vector.load %arg4[%c4_80, %c0_81, %c0_82] : memref<9x16x8xf32, #tpu.memory_space<vmem>>, vector<1x16x8xf32>
    %86 = vector.shape_cast %85 : vector<1x16x8xf32> to vector<16x8xf32>
    %cst_83 = arith.constant dense<0.000000e+00> : vector<16x160xf32>
    %87 = tpu.matmul %86, %84, %cst_83 {dimension_numbers = #tpu.dot_dimension_numbers<[1], [0], [0], [1], [0, 0, 1, 1], [], []>} : vector<16x8xf32>, vector<8x160xf32>, vector<16x160xf32> -> vector<16x160xf32>
    %88 = arith.addf %83, %87 : vector<16x160xf32>
    %c0_84 = arith.constant 0 : index
    %c36 = arith.constant 36 : index
    %89 = vector.load %arg10[%c0_84, %c36] : memref<8x228xf32, #tpu.memory_space<vmem>>, vector<8x160xf32>
    %c5_85 = arith.constant 5 : index
    %c0_86 = arith.constant 0 : index
    %c0_87 = arith.constant 0 : index
    %90 = vector.load %arg4[%c5_85, %c0_86, %c0_87] : memref<9x16x8xf32, #tpu.memory_space<vmem>>, vector<1x16x8xf32>
    %91 = vector.shape_cast %90 : vector<1x16x8xf32> to vector<16x8xf32>
    %cst_88 = arith.constant dense<0.000000e+00> : vector<16x160xf32>
    %92 = tpu.matmul %91, %89, %cst_88 {dimension_numbers = #tpu.dot_dimension_numbers<[1], [0], [0], [1], [0, 0, 1, 1], [], []>} : vector<16x8xf32>, vector<8x160xf32>, vector<16x160xf32> -> vector<16x160xf32>
    %93 = arith.addf %88, %92 : vector<16x160xf32>
    %c0_89 = arith.constant 0 : index
    %c64 = arith.constant 64 : index
    %94 = vector.load %arg10[%c0_89, %c64] : memref<8x228xf32, #tpu.memory_space<vmem>>, vector<8x160xf32>
    %c6_90 = arith.constant 6 : index
    %c0_91 = arith.constant 0 : index
    %c0_92 = arith.constant 0 : index
    %95 = vector.load %arg4[%c6_90, %c0_91, %c0_92] : memref<9x16x8xf32, #tpu.memory_space<vmem>>, vector<1x16x8xf32>
    %96 = vector.shape_cast %95 : vector<1x16x8xf32> to vector<16x8xf32>
    %cst_93 = arith.constant dense<0.000000e+00> : vector<16x160xf32>
    %97 = tpu.matmul %96, %94, %cst_93 {dimension_numbers = #tpu.dot_dimension_numbers<[1], [0], [0], [1], [0, 0, 1, 1], [], []>} : vector<16x8xf32>, vector<8x160xf32>, vector<16x160xf32> -> vector<16x160xf32>
    %98 = arith.addf %93, %97 : vector<16x160xf32>
    %c0_94 = arith.constant 0 : index
    %c66 = arith.constant 66 : index
    %99 = vector.load %arg10[%c0_94, %c66] : memref<8x228xf32, #tpu.memory_space<vmem>>, vector<8x160xf32>
    %c7_95 = arith.constant 7 : index
    %c0_96 = arith.constant 0 : index
    %c0_97 = arith.constant 0 : index
    %100 = vector.load %arg4[%c7_95, %c0_96, %c0_97] : memref<9x16x8xf32, #tpu.memory_space<vmem>>, vector<1x16x8xf32>
    %101 = vector.shape_cast %100 : vector<1x16x8xf32> to vector<16x8xf32>
    %cst_98 = arith.constant dense<0.000000e+00> : vector<16x160xf32>
    %102 = tpu.matmul %101, %99, %cst_98 {dimension_numbers = #tpu.dot_dimension_numbers<[1], [0], [0], [1], [0, 0, 1, 1], [], []>} : vector<16x8xf32>, vector<8x160xf32>, vector<16x160xf32> -> vector<16x160xf32>
    %103 = arith.addf %98, %102 : vector<16x160xf32>
    %c0_99 = arith.constant 0 : index
    %c68 = arith.constant 68 : index
    %104 = vector.load %arg10[%c0_99, %c68] : memref<8x228xf32, #tpu.memory_space<vmem>>, vector<8x160xf32>
    %c8_100 = arith.constant 8 : index
    %c0_101 = arith.constant 0 : index
    %c0_102 = arith.constant 0 : index
    %105 = vector.load %arg4[%c8_100, %c0_101, %c0_102] : memref<9x16x8xf32, #tpu.memory_space<vmem>>, vector<1x16x8xf32>
    %106 = vector.shape_cast %105 : vector<1x16x8xf32> to vector<16x8xf32>
    %cst_103 = arith.constant dense<0.000000e+00> : vector<16x160xf32>
    %107 = tpu.matmul %106, %104, %cst_103 {dimension_numbers = #tpu.dot_dimension_numbers<[1], [0], [0], [1], [0, 0, 1, 1], [], []>} : vector<16x8xf32>, vector<8x160xf32>, vector<16x160xf32> -> vector<16x160xf32>
    %108 = arith.addf %103, %107 : vector<16x160xf32>
    %c0_104 = arith.constant 0 : index
    %c0_105 = arith.constant 0 : index
    %109 = vector.load %arg5[%c0_104, %c0_105] : memref<16x1xf32, #tpu.memory_space<vmem>>, vector<16x1xf32>
    %110 = vector.broadcast %109 : vector<16x1xf32> to vector<16x160xf32>
    %111 = arith.addf %108, %110 : vector<16x160xf32>
    %cst_106 = arith.constant 0.000000e+00 : f32
    %112 = vector.broadcast %cst_106 : f32 to vector<16x160xf32>
    %113 = arith.cmpf ogt, %111, %112 : vector<16x160xf32>
    %cst_107 = arith.constant 0.000000e+00 : f32
    %114 = vector.broadcast %cst_107 : f32 to vector<16x160xf32>
    %115 = arith.minimumf %111, %114 : vector<16x160xf32>
    %116 = math.exp %115 : vector<16x160xf32>
    %cst_108 = arith.constant 1.000000e+00 : f32
    %117 = vector.broadcast %cst_108 : f32 to vector<16x160xf32>
    %118 = arith.subf %116, %117 : vector<16x160xf32>
    %119 = arith.select %113, %111, %118 : vector<16x160xi1>, vector<16x160xf32>
    %c0_109 = arith.constant 0 : index
    %c0_110 = arith.constant 0 : index
    %120 = vector.load %arg11[%c0_109, %c0_110] : memref<16x160xf32, #tpu.memory_space<vmem>>, vector<16x160xf32>
    tpu.vector_store %arg11[%c0_109, %c0_110], %119 {strides = array<i32>} : memref<16x160xf32, #tpu.memory_space<vmem>>, vector<16x160xf32>,
    %c0_111 = arith.constant 0 : index
    %c0_112 = arith.constant 0 : index
    %121 = vector.load %arg11[%c0_111, %c0_112] : memref<16x160xf32, #tpu.memory_space<vmem>>, vector<16x160xf32>
    %c0_113 = arith.constant 0 : index
    %c0_114 = arith.constant 0 : index
    %c0_115 = arith.constant 0 : index
    %122 = vector.load %arg6[%c0_113, %c0_114, %c0_115] : memref<1x8x16xf32, #tpu.memory_space<vmem>>, vector<1x8x16xf32>
    %123 = vector.shape_cast %122 : vector<1x8x16xf32> to vector<8x16xf32>
    %cst_116 = arith.constant dense<0.000000e+00> : vector<8x160xf32>
    %124 = tpu.matmul %123, %121, %cst_116 {dimension_numbers = #tpu.dot_dimension_numbers<[1], [0], [0], [1], [0, 0, 1, 1], [], []>} : vector<8x16xf32>, vector<16x160xf32>, vector<8x160xf32> -> vector<8x160xf32>
    %c0_117 = arith.constant 0 : index
    %c0_118 = arith.constant 0 : index
    %125 = vector.load %arg7[%c0_117, %c0_118] : memref<8x1xf32, #tpu.memory_space<vmem>>, vector<8x1xf32>
    %126 = vector.broadcast %125 : vector<8x1xf32> to vector<8x160xf32>
    %127 = arith.addf %124, %126 : vector<8x160xf32>
    %128 = vector.extract_strided_slice %127 {offsets = [0, 0], sizes = [4, 160], strides = [1, 1]} : vector<8x160xf32> to vector<4x160xf32>
    %cst_119 = arith.constant dense<0xFF800000> : vector<160xf32>
    %129 = vector.multi_reduction <maximumf>, %128, %cst_119 [0] : vector<4x160xf32> to vector<160xf32>
    %130 = vector.shape_cast %129 : vector<160xf32> to vector<1x160xf32>
    %131 = vector.broadcast %130 : vector<1x160xf32> to vector<4x160xf32>
    %132 = arith.subf %128, %131 : vector<4x160xf32>
    %133 = math.exp %132 : vector<4x160xf32>
    %cst_120 = arith.constant dense<0.000000e+00> : vector<160xf32>
    %134 = vector.multi_reduction <add>, %133, %cst_120 [0] : vector<4x160xf32> to vector<160xf32>
    %135 = vector.shape_cast %134 : vector<160xf32> to vector<1x160xf32>
    %136 = tpu.reciprocal %135 {approx = true} : vector<1x160xf32> -> vector<1x160xf32>
    %137 = vector.broadcast %136 : vector<1x160xf32> to vector<4x160xf32>
    %138 = arith.mulf %133, %137 : vector<4x160xf32>
    %139 = math.log %135 : vector<1x160xf32>
    %140 = vector.broadcast %139 : vector<1x160xf32> to vector<4x160xf32>
    %141 = arith.subf %132, %140 : vector<4x160xf32>
    %142 = vector.extract_strided_slice %127 {offsets = [4, 0], sizes = [4, 160], strides = [1, 1]} : vector<8x160xf32> to vector<4x160xf32>
    %cst_121 = arith.constant dense<0xFF800000> : vector<160xf32>
    %143 = vector.multi_reduction <maximumf>, %142, %cst_121 [0] : vector<4x160xf32> to vector<160xf32>
    %144 = vector.shape_cast %143 : vector<160xf32> to vector<1x160xf32>
    %145 = vector.broadcast %144 : vector<1x160xf32> to vector<4x160xf32>
    %146 = arith.subf %142, %145 : vector<4x160xf32>
    %147 = math.exp %146 : vector<4x160xf32>
    %cst_122 = arith.constant dense<0.000000e+00> : vector<160xf32>
    %148 = vector.multi_reduction <add>, %147, %cst_122 [0] : vector<4x160xf32> to vector<160xf32>
    %149 = vector.shape_cast %148 : vector<160xf32> to vector<1x160xf32>
    %150 = tpu.reciprocal %149 {approx = true} : vector<1x160xf32> -> vector<1x160xf32>
    %151 = vector.broadcast %150 : vector<1x160xf32> to vector<4x160xf32>
    %152 = arith.mulf %147, %151 : vector<4x160xf32>
    %153 = math.log %149 : vector<1x160xf32>
    %154 = vector.broadcast %153 : vector<1x160xf32> to vector<4x160xf32>
    %155 = arith.subf %146, %154 : vector<4x160xf32>
    %156 = tpu.concatenate %138, %152 in 0 : vector<4x160xf32>, vector<4x160xf32> -> vector<8x160xf32>
    %c0_123 = arith.constant 0 : index
    %c0_124 = arith.constant 0 : index
    %c0_125 = arith.constant 0 : index
    %157 = vector.load %arg8[%c0_123, %c0_124, %c0_125] : memref<1x8x160xf32, #tpu.memory_space<vmem>>, vector<1x8x160xf32>
    %158 = vector.shape_cast %157 : vector<1x8x160xf32> to vector<8x160xf32>
    %159 = vector.shape_cast %156 : vector<8x160xf32> to vector<1x8x160xf32>
    tpu.vector_store %arg8[%c0_123, %c0_124, %c0_125], %159 {strides = array<i32>} : memref<1x8x160xf32, #tpu.memory_space<vmem>>, vector<1x8x160xf32>,
    %160 = tpu.concatenate %141, %155 in 0 : vector<4x160xf32>, vector<4x160xf32> -> vector<8x160xf32>
    %c0_126 = arith.constant 0 : index
    %c0_127 = arith.constant 0 : index
    %c0_128 = arith.constant 0 : index
    %161 = vector.load %arg9[%c0_126, %c0_127, %c0_128] : memref<1x8x160xf32, #tpu.memory_space<vmem>>, vector<1x8x160xf32>
    %162 = vector.shape_cast %161 : vector<1x8x160xf32> to vector<8x160xf32>
    %163 = vector.shape_cast %160 : vector<8x160xf32> to vector<1x8x160xf32>
    tpu.vector_store %arg9[%c0_126, %c0_127, %c0_128], %163 {strides = array<i32>} : memref<1x8x160xf32, #tpu.memory_space<vmem>>, vector<1x8x160xf32>,
    return
  }
  func.func @transform_0(%arg0: i32) -> (i32, i32, i32) {
    %c0_i32 = arith.constant 0 : i32
    %c0_i32_0 = arith.constant 0 : i32
    %c0_i32_1 = arith.constant 0 : i32
    return %arg0, %c0_i32, %c0_i32_0 : i32, i32, i32
  }
  func.func @transform_1(%arg0: i32) -> (i32, i32, i32) {
    %c0_i32 = arith.constant 0 : i32
    %c0_i32_0 = arith.constant 0 : i32
    %c0_i32_1 = arith.constant 0 : i32
    %c0_i32_2 = arith.constant 0 : i32
    return %c0_i32, %c0_i32_0, %c0_i32_1 : i32, i32, i32
  }
  func.func @transform_2(%arg0: i32) -> (i32, i32) {
    %c0_i32 = arith.constant 0 : i32
    %c0_i32_0 = arith.constant 0 : i32
    %c0_i32_1 = arith.constant 0 : i32
    return %c0_i32, %c0_i32_0 : i32, i32
  }
  func.func @transform_3(%arg0: i32) -> (i32, i32, i32) {
    %c0_i32 = arith.constant 0 : i32
    %c0_i32_0 = arith.constant 0 : i32
    %c0_i32_1 = arith.constant 0 : i32
    %c0_i32_2 = arith.constant 0 : i32
    return %c0_i32, %c0_i32_0, %c0_i32_1 : i32, i32, i32
  }
  func.func @transform_4(%arg0: i32) -> (i32, i32) {
    %c0_i32 = arith.constant 0 : i32
    %c0_i32_0 = arith.constant 0 : i32
    %c0_i32_1 = arith.constant 0 : i32
    return %c0_i32, %c0_i32_0 : i32, i32
  }
  func.func @transform_5(%arg0: i32) -> (i32, i32, i32) {
    %c0_i32 = arith.constant 0 : i32
    %c0_i32_0 = arith.constant 0 : i32
    %c0_i32_1 = arith.constant 0 : i32
    %c0_i32_2 = arith.constant 0 : i32
    return %c0_i32, %c0_i32_0, %c0_i32_1 : i32, i32, i32
  }
  func.func @transform_6(%arg0: i32) -> (i32, i32) {
    %c0_i32 = arith.constant 0 : i32
    %c0_i32_0 = arith.constant 0 : i32
    %c0_i32_1 = arith.constant 0 : i32
    return %c0_i32, %c0_i32_0 : i32, i32
  }
  func.func @transform_7(%arg0: i32) -> (i32, i32, i32) {
    %c0_i32 = arith.constant 0 : i32
    %c0_i32_0 = arith.constant 0 : i32
    %c0_i32_1 = arith.constant 0 : i32
    return %arg0, %c0_i32, %c0_i32_0 : i32, i32, i32
  }
  func.func @transform_8(%arg0: i32) -> (i32, i32, i32) {
    %c0_i32 = arith.constant 0 : i32
    %c0_i32_0 = arith.constant 0 : i32
    %c0_i32_1 = arith.constant 0 : i32
    return %arg0, %c0_i32, %c0_i32_0 : i32, i32, i32
  }
}

</mosaic_0001>

<bundles_post_ra>
// kernel: forward.1
= control target key start
LH: loop header
LB: loop body
LE: loop exit
PB: predicated region body
PF: predicated region fallthrough
CT: control target
= control target key end

     0   :  { %s2660_s27 = smov 0   ;;  %s2911_s0 = inlined_call_operand.vmem [shape: f32[2,2,384], index: 0, kind: input, shape index: {}]   ;;  %s2912_s1 = inlined_call_operand.vmem [shape: f32[9,8,2], index: 1, kind: input, shape index: {}]   ;;  %s2913_s2 = inlined_call_operand.vmem [shape: f32[8,1], index: 2, kind: input, shape index: {}]   ;;  %s2914_s3 = inlined_call_operand.vmem [shape: f32[9,16,8], index: 3, kind: input, shape index: {}]   ;;  %s2915_s4 = inlined_call_operand.vmem [shape: f32[16,1], index: 4, kind: input, shape index: {}]   ;;  %s2916_s5 = inlined_call_operand.vmem [shape: f32[1,8,16], index: 5, kind: input, shape index: {}]   ;;  %s2917_s6 = inlined_call_operand.vmem [shape: f32[8,1], index: 6, kind: input, shape index: {}]   ;;  %s2918_s7 = inlined_call_operand.vmem [shape: f32[2,8,160], index: 7, kind: output, shape index: {0}]   ;;  %s2919_s8 = inlined_call_operand.vmem [shape: f32[2,8,160], index: 8, kind: output, shape index: {1}]  }
   0x1 LB: > { %s2430_s28 = sadd.s32 4294967295, %s2597_s27   ;;  %p2434_p0 = scmp.ge.s32.totalorder %s2597_s27, 1  ;;  %s2597_s27 = sphi %s2660_s27, %s19_s27  }
   0x2   : > { %p265_p1 = scmp.lt.s32.totalorder %s2597_s27, 3 }
   0x4   : > { %p266_p2 = pnand %p2434_p0, %p265_p1 }
   0x5   : > { %p304_p3 = scmp.lt.s32.totalorder (!%p266_p2), %s2430_s28, 1  ;;  %s2600_s11 = smov (!%p266_p2), 126  }
   0x6   : > { %269 = sbr.rel (%p266_p2) target bundleno = 1048 (0x418), region = 48  ;;  %s2601_s12 = smov (!%p266_p2), 127  }
   0x7   : > { %s2603_s15 = smov (!%p266_p2), 112   ;;  %s2604_s16 = smov (!%p266_p2), 111  }
   0x8   : > { %s2605_s17 = smov (!%p266_p2), 110   ;;  %s2606_s18 = smov (!%p266_p2), 96  }
   0x9   : > { %s2607_s19 = smov (!%p266_p2), 95   ;;  %s2609_s20 = smov (!%p266_p2), 94  }
   0xa   : > { %s2610_s22 = smov (!%p266_p2), 124   ;;  %s2613_s30 = smov (!%p266_p2), 62  }
   0xb   : > { %s2921_s28 = smov (!%p304_p3, %s2430_s28), 1  ;;  %v2599_v0 = vmov 0.0   ;;  %vm342_vm0 = vcmask 1041408   ;;  %v2602_v3 = vmov 1983009808   ;;  %v896_v5 = vlaneseq  ;;  %v320_v6 = vld [vmem:[%s2912_s1] sm:$0xff] }
   0xc   : > { %489 = vmatprep.mubr.f32.mxu1 %v2599_v0  ;;  %411 = vmatprep.mubr.f32.mxu0 %v2599_v0  ;;  %s2525_s29 = smul.u32 6, %s2921_s28  ;;  %v894_v4 = vunpack.c.l.s4 %v2602_v3  ;;  %vm338_vm1 = vcmask 15360   ;;  %v2608_v23 = vmov 0   ;;  %v1215_v26 = vld [vmem:[%s2913_s2] sm:$0xff]  ;;  %vm610_vm2 = vcmask 916480   ;;  %v2440_v33 = vld [vmem:[%s2912_s1 + $0x8] sm:$0xff] }
   0xd   : > { %v897_v8 = vshrl.u32 %v896_v5, 7  ;;  %2550 = vset.pattern.permute.xlu1 %v2608_v23  ;;  %2551 = vset.pattern.permute.xlu0 %v2608_v23  ;;  %vm336_vm3 = vcmask 1039360   ;;  %vm512_vm4 = vcmask 1031168   ;;  %vm708_vm5 = vcmask 908288   ;;  %v2453_v36 = vld [vmem:[%s2912_s1 + $0x18] sm:$0xff]  ;;  %v2448_v40 = vld [vmem:[%s2912_s1 + $0x10] sm:$0xff] }
   0xe   : > { %s2676_s10 = scalar_lea.vmem %s2911_s0, %s2525_s29  ;;  %v895_v7 = vunpack.c.0.s8 %v894_v4  ;;  %vm806_vm6 = vcmask 900096   ;;  %v2458_v44 = vld [vmem:[%s2912_s1 + $0x20] sm:$0xff]  ;;  %v2463_v45 = vld [vmem:[%s2912_s1 + $0x28] sm:$0xff]  ;;  %vm914_vm7 = vcmask 785408   ;;  %v2468_v52 = vld [vmem:[%s2912_s1 + $0x30] sm:$0xff]  ;;  %vm1023_vm8 = vcmask 777216  }
   0xf   : > { %v2449_v1 = vld.sshfl [vmem:[%s2676_s10] sm:$0x33 pattern:$0x76325410]  ;;  %v2472_v58 = vld [vmem:[%s2912_s1 + $0x38] sm:$0xff]  ;;  %vm1132_vm9 = vcmask 769024  }
  0x10   : > { %508 = vrot.lane.b32.xlu1 %v2449_v1, %s2600_s11  ;;  %v507_v2 = vcombine.high %v2449_v1, %v2449_v1  ;;  %332 = vrot.lane.b32.xlu0 %v2449_v1, %s2601_s12  ;;  %v898_v9 = vsub.s32 %v895_v7, %v897_v8  ;;  %v888_v10 = vld [vmem:[%s2676_s10] sm:$0x3f]  ;;  %vm1236_vm11 = vcmask 818176   ;;  %vm1254_vm13 = vcmask 64512   ;;  %s2611_s29 = smov 92   ;;  %s2614_s9 = smov 60  }
  0x11   : > { %v892_v11 = vcombine.high %v888_v10, %v888_v10  ;;  %v997_v13 = vld [vmem:[%s2676_s10] sm:$0x3f]  ;;  %vm1428_vm14 = vcmask 1014784   ;;  %vm1720_vm15 = vcmask 752640  }
  0x12   : > { %2445 = vmatprep.subr.msk.mxu1 %vm342_vm0, %v507_v2  ;;  %v899_v12 = vrot.slane %v888_v10, %v898_v9  ;;  %v1008_v16 = vrot.slane %v997_v13, %v898_v9  ;;  %v1001_v18 = vcombine.high %v997_v13, %v997_v13  ;;  %v1106_v19 = vld [vmem:[%s2676_s10] sm:$0x3f]  ;;  %s2523_s10 = sshll.u32 %s2921_s28, 4 }
  0x13   : > { %2446 = vmatpush1.msk.msra.mxu1 %vm342_vm0, %v2449_v1  ;;  %v906_v14 = vrot.slane %v892_v11, %v898_v9  ;;  %v1110_v21 = vcombine.high %v1106_v19, %v1106_v19  ;;  %v1117_v22 = vrot.slane %v1106_v19, %v898_v9  ;;  %v2476_v63 = vld [vmem:[%s2912_s1 + $0x40] sm:$0xff]  ;;  %s313_s14 = scalar_lea.vmem %s2918_s7, %s2523_s10  ;;  %s318_s28 = scalar_lea.vmem %s2919_s8, %s2523_s10 }
  0x14   : > { %510 = vrot.lane.b32.xlu1 %v507_v2, %s2600_s11  ;;  %606 = vrot.lane.b32.xlu0 %v2449_v1, %s2603_s15  ;;  %v907_v15 = vcombine.high %v899_v12, %v899_v12  ;;  %v1016_v17 = vcombine.high %v1008_v16, %v1008_v16  ;;  %v1015_v20 = vrot.slane %v1001_v18, %v898_v9 }
  0x15   : > { %2447 = vmatmul.mubr.msk.f32.vlgmr.msra.gmra.mxu1 %vm338_vm1, %v320_v6  ;;  %v1124_v24 = vrot.slane %v1110_v21, %v898_v9  ;;  %v1125_v25 = vcombine.high %v1117_v22, %v1117_v22 }
  0x16   : > { %683 = vmatprep.mubr.f32.mxu1 %v2599_v0 }
  0x18   : > { %608 = vrot.lane.b32.xlu1 %v507_v2, %s2603_s15  ;;  %334 = vrot.lane.b32.xlu0 %v507_v2, %s2601_s12 }
  0x1c   : > { %706 = vrot.lane.b32.xlu1 %v507_v2, %s2604_s16  ;;  %704 = vrot.lane.b32.xlu0 %v2449_v1, %s2604_s16 }
  0x20   : > { %804 = vrot.lane.b32.xlu1 %v507_v2, %s2605_s17  ;;  %802 = vrot.lane.b32.xlu0 %v2449_v1, %s2605_s17 }
  0x24   : > { %912 = vrot.lane.b32.xlu1 %v906_v14, %s2606_s18  ;;  %910 = vrot.lane.b32.xlu0 %v907_v15, %s2606_s18 }
  0x28   : > { %1019 = vrot.lane.b32.xlu1 %v1016_v17, %s2607_s19  ;;  %908 = vrot.lane.b32.xlu0 %v899_v12, %s2606_s18 }
  0x2c   : > { %1017 = vrot.lane.b32.xlu1 %v1008_v16, %s2607_s19  ;;  %1021 = vrot.lane.b32.xlu0 %v1015_v20, %s2607_s19 }
  0x30   : > { %1130 = vrot.lane.b32.xlu1 %v1124_v24, %s2609_s20  ;;  %1128 = vrot.lane.b32.xlu0 %v1125_v25, %s2609_s20 }
  0x34   : > { %1126 = vrot.lane.b32.xlu0 %v1117_v22, %s2609_s20  ;;  %1218 = vperm.xlu1 %2550, %v1215_v26  }
  0x82   : > { %v509_v27 = vpop.permute.xlu1 %508  ;;  %v333_v28 = vpop.permute.xlu0 %332 }
  0x86   : > { %v511_v29 = vpop.permute.xlu1 %510  ;;  %v607_v30 = vpop.permute.xlu0 %606 }
  0x87   : > { %v513_v37 = vsel %vm512_vm4, %v509_v27, %v511_v29 }
  0x8a   : > { %v609_v31 = vpop.permute.xlu1 %608  ;;  %v335_v32 = vpop.permute.xlu0 %334 }
  0x8b   : > { %v611_v34 = vsel %vm610_vm2, %v607_v30, %v609_v31  ;;  %2442 = vmatprep.subr.msk.mxu0 %vm342_vm0, %v335_v32  ;;  %2455 = vmatprep.subr.msk.mxu1 %vm342_vm0, %v609_v31  ;;  %v337_v35 = vsel %vm336_vm3, %v333_v28, %v335_v32  ;;  %vm2014_vm2 = vcmask 490496  }
  0x8c   : > { %2443 = vmatpush1.msk.msra.mxu0 %vm342_vm0, %v337_v35  ;;  %2456 = vmatpush1.msk.msra.mxu1 %vm342_vm0, %v611_v34 }
  0x8d   : > { %2444 = vmatmul.mubr.msk.f32.vlgmr.msra.gmra.mxu0 %vm338_vm1, %v2440_v33  ;;  %2450 = vmatprep.subr.msk.mxu0 %vm342_vm0, %v511_v29 }
  0x8e   : > { %v707_v38 = vpop.permute.xlu1 %706  ;;  %2451 = vmatpush1.msk.msra.mxu0 %vm342_vm0, %v513_v37  ;;  %v705_v39 = vpop.permute.xlu0 %704  ;;  %585 = vmatprep.mubr.f32.mxu0 %v2599_v0 }
  0x8f   : > { %v709_v41 = vsel %vm708_vm5, %v705_v39, %v707_v38  ;;  %2460 = vmatprep.subr.msk.mxu0 %vm342_vm0, %v707_v38  ;;  %2457 = vmatmul.mubr.msk.f32.vlgmr.msra.gmra.mxu1 %vm338_vm1, %v2453_v36 }
  0x90   : > { %879 = vmatprep.mubr.f32.mxu1 %v2599_v0 }
  0x91   : > { %2452 = vmatmul.mubr.msk.f32.vlgmr.msra.gmra.mxu0 %vm338_vm1, %v2448_v40 }
  0x92   : > { %2461 = vmatpush1.msk.msra.mxu0 %vm342_vm0, %v709_v41  ;;  %v805_v42 = vpop.permute.xlu1 %804  ;;  %v803_v43 = vpop.permute.xlu0 %802  ;;  %781 = vmatprep.mubr.f32.mxu0 %v2599_v0 }
  0x93   : > { %v807_v46 = vsel %vm806_vm6, %v803_v43, %v805_v42  ;;  %2465 = vmatprep.subr.msk.mxu1 %vm342_vm0, %v805_v42 }
  0x94   : > { %2466 = vmatpush1.msk.msra.mxu1 %vm342_vm0, %v807_v46 }
  0x95   : > { %2462 = vmatmul.mubr.msk.f32.vlgmr.msra.gmra.mxu0 %vm338_vm1, %v2458_v44  ;;  %2467 = vmatmul.mubr.msk.f32.vlgmr.msra.gmra.mxu1 %vm338_vm1, %v2463_v45 }
  0x96   : > { %v913_v47 = vpop.permute.xlu1 %912  ;;  %v911_v48 = vpop.permute.xlu0 %910  ;;  %988 = vmatprep.mubr.f32.mxu0 %v2599_v0  ;;  %1097 = vmatprep.mubr.f32.mxu1 %v2599_v0 }
  0x97   : > { %v916_v49 = vsel %vm914_vm7, %v911_v48, %v913_v47 }
  0x98   : > { %2469 = vmatprep.subr.msk.mxu0 %vm342_vm0, %v916_v49 }
  0x9a   : > { %v1020_v50 = vpop.permute.xlu1 %1019  ;;  %v909_v51 = vpop.permute.xlu0 %908 }
  0x9b   : > { %v915_v53 = vsel %vm914_vm7, %v909_v51, %v911_v48  ;;  %v1241_v51 = vld [vmem:[%s2914_s3 + $0x8] sm:$0xff] }
  0x9c   : > { %2470 = vmatpush1.msk.msra.mxu0 %vm342_vm0, %v915_v53  ;;  %v2106_v53 = vld [vmem:[%s2915_s4 + $0x8] sm:$0xff] }
  0x9d   : > { %2471 = vmatmul.mubr.msk.f32.vlgmr.msra.gmra.mxu0 %vm338_vm1, %v2468_v52  ;;  %v2105_v52 = vld [vmem:[%s2915_s4] sm:$0xff] }
  0x9e   : > { %v1018_v54 = vpop.permute.xlu1 %1017  ;;  %v1022_v55 = vpop.permute.xlu0 %1021  ;;  %1206 = vmatprep.mubr.f32.mxu0 %v2599_v0 }
  0x9f   : > { %v1024_v56 = vsel %vm1023_vm8, %v1018_v54, %v1020_v50  ;;  %v1025_v57 = vsel %vm1023_vm8, %v1020_v50, %v1022_v55  ;;  %v1240_v50 = vld [vmem:[%s2914_s3] sm:$0xff]  ;;  %vm2161_vm8 = vcmask 130048  }
  0xa0   : > { %2473 = vmatprep.subr.msk.mxu1 %vm342_vm0, %v1025_v57  ;;  %v2155_v54 = vld [vmem:[%s2917_s6] sm:$0xff] }
  0xa1   : > { %2474 = vmatpush1.msk.msra.mxu1 %vm342_vm0, %v1024_v56 }
  0xa2   : > { %v1131_v59 = vpop.permute.xlu1 %1130  ;;  %v1129_v60 = vpop.permute.xlu0 %1128  ;;  %2475 = vmatmul.mubr.msk.f32.vlgmr.msra.gmra.mxu1 %vm338_vm1, %v2472_v58 }
  0xa3   : > { %v1134_v61 = vsel %vm1132_vm9, %v1129_v60, %v1131_v59  ;;  %1325 = vmatprep.mubr.f32.mxu1 %v2599_v0  ;;  %v2482_v59 = vld [vmem:[%s2914_s3 + $0x10] sm:$0xff] }
  0xa4   : > { %2477 = vmatprep.subr.msk.mxu0 %vm342_vm0, %v1134_v61 }
  0xa6   : > { %v1127_v62 = vpop.permute.xlu0 %1126 }
  0xa7   : > { %v1133_v1 = vsel %vm1132_vm9, %v1127_v62, %v1129_v60  ;;  %v2483_v62 = vld [vmem:[%s2914_s3 + $0x18] sm:$0xff] }
  0xa8   : > { %2478 = vmatpush1.msk.msra.mxu0 %vm342_vm0, %v1133_v1  ;;  %vm1818_vm0 = vcmask 523264  }
  0xa9   : > { %2479 = vmatmul.mubr.msk.f32.vlgmr.msra.gmra.mxu0 %vm338_vm1, %v2476_v63  ;;  %vm1916_vm1 = vcmask 506880  }
  0xaa   : > { %1408 = vmatprep.mubr.f32.mxu0 %v2599_v0 }
  0xaf   : > { %v1219_v32 = vpop.permute.xlu1 %1218 }
  0xd5   : > { %v491_v2 = vpop.f32.mrf.mxu1 }
  0xd7   : > { %v493_v5 = vpop.f32.mrf.mxu1 }
 0x14d   : > { %v413_v3 = vpop.f32.mrf.mxu0 }
 0x14e   : > { %v492_v6 = vadd.f32 %v491_v2, %v413_v3  ;;  %v2488_v3 = vld [vmem:[%s2914_s3 + $0x20] sm:$0xff] }
 0x14f   : > { %v415_v4 = vpop.f32.mrf.mxu0  ;;  %v685_v10 = vpop.f32.mrf.mxu1 }
 0x150   : > { %v494_v8 = vadd.f32 %v493_v5, %v415_v4  ;;  %v2492_v4 = vld [vmem:[%s2914_s3 + $0x30] sm:$0xff] }
 0x151   : > { %v587_v7 = vpop.f32.mrf.mxu0  ;;  %v687_v13 = vpop.f32.mrf.mxu1 }
 0x152   : > { %v592_v11 = vadd.f32 %v587_v7, %v492_v6 }
 0x153   : > { %v589_v9 = vpop.f32.mrf.mxu0 }
 0x154   : > { %v593_v12 = vadd.f32 %v589_v9, %v494_v8  ;;  %v690_v15 = vadd.f32 %v685_v10, %v592_v11  ;;  %v2489_v8 = vld [vmem:[%s2914_s3 + $0x28] sm:$0xff]  ;;  %v2493_v9 = vld [vmem:[%s2914_s3 + $0x38] sm:$0xff] }
 0x155   : > { %v783_v14 = vpop.f32.mrf.mxu0  ;;  %v881_v18 = vpop.f32.mrf.mxu1 }
 0x156   : > { %v691_v16 = vadd.f32 %v687_v13, %v593_v12  ;;  %v788_v19 = vadd.f32 %v783_v14, %v690_v15  ;;  %v2496_v13 = vld [vmem:[%s2914_s3 + $0x40] sm:$0xff]  ;;  %v2500_v14 = vld [vmem:[%s2914_s3 + $0x50] sm:$0xff] }
 0x157   : > { %v785_v17 = vpop.f32.mrf.mxu0  ;;  %v883_v21 = vpop.f32.mrf.mxu1 }
 0x158   : > { %v789_v20 = vadd.f32 %v785_v17, %v691_v16  ;;  %v886_v23 = vadd.f32 %v881_v18, %v788_v19  ;;  %v2497_v17 = vld [vmem:[%s2914_s3 + $0x48] sm:$0xff]  ;;  %v2501_v18 = vld [vmem:[%s2914_s3 + $0x58] sm:$0xff] }
 0x15a   : > { %v887_v24 = vadd.f32 %v883_v21, %v789_v20 }
 0x15d   : > { %v990_v22 = vpop.f32.mrf.mxu0 }
 0x15e   : > { %v995_v27 = vadd.f32 %v990_v22, %v886_v23  ;;  %v2504_v22 = vld [vmem:[%s2914_s3 + $0x60] sm:$0xff]  ;;  %v2508_v23 = vld [vmem:[%s2914_s3 + $0x70] sm:$0xff] }
 0x15f   : > { %v992_v25 = vpop.f32.mrf.mxu0 }
 0x160   : > { %v996_v28 = vadd.f32 %v992_v25, %v887_v24 }
 0x162   : > { %v1099_v26 = vpop.f32.mrf.mxu1 }
 0x163   : > { %v1104_v30 = vadd.f32 %v1099_v26, %v995_v27  ;;  %v2505_v27 = vld [vmem:[%s2914_s3 + $0x68] sm:$0xff] }
 0x164   : > { %v1101_v29 = vpop.f32.mrf.mxu1 }
 0x165   : > { %v1105_v33 = vadd.f32 %v1101_v29, %v996_v28  ;;  %v2509_v28 = vld [vmem:[%s2914_s3 + $0x78] sm:$0xff] }
 0x169   : > { %v1208_v31 = vpop.f32.mrf.mxu0 }
 0x16a   : > { %v1213_v34 = vadd.f32 %v1208_v31, %v1104_v30  ;;  %v2512_v30 = vld [vmem:[%s2914_s3 + $0x80] sm:$0xff]  ;;  %v2513_v31 = vld [vmem:[%s2914_s3 + $0x88] sm:$0xff] }
 0x16b   : > { %v1210_v35 = vpop.f32.mrf.mxu0 }
 0x16c   : > { %v1221_v36 = vadd.f32 %v1219_v32, %v1213_v34  ;;  %v1214_v37 = vadd.f32 %v1210_v35, %v1105_v33 }
 0x16e   : > { %v1225_v38 = vmin.f32 %v1221_v36, 0.0  ;;  %v1222_v39 = vadd.f32 %v1219_v32, %v1214_v37  ;;  %vm1223_vm10 = vcmp.gt.f32.partialorder %v1221_v36, 0.0 }
 0x170   : > { %v1227_v40 = vmul.f32 1.442695, %v1225_v38  ;;  %v1226_v41 = vmin.f32 %v1222_v39, 0.0  ;;  %vm1224_vm12 = vcmp.gt.f32.partialorder %v1222_v39, 0.0 }
 0x172   : > { %2555 = vpow2.f32 %v1227_v40  ;;  %v1229_v42 = vmul.f32 1.442695, %v1226_v41 }
 0x174   : > { %2557 = vpow2.f32 %v1229_v42 }
 0x17f   : > { %v2556_v43 = vpop.eup %2555 }
 0x180   : > { %v2480_v44 = vadd.f32 -1.0, %v2556_v43 }
 0x181   : > { %v2558_v45 = vpop.eup %2557 }
 0x182   : > { %v1233_v46 = vsel %vm1223_vm10, %v1221_v36, %v2480_v44  ;;  %v2481_v47 = vadd.f32 -1.0, %v2558_v45  ;;  %vm2282_vm10 = vcmask 1047556  }
 0x183   : > { %1247 = vrot.lane.b32.xlu0 %v1233_v46, %s2600_s11 }
 0x184   : > { %v1234_v48 = vsel %vm1224_vm12, %v1222_v39, %v2481_v47  ;;  %vm2290_vm12 = vcmask 261124  }
 0x185   : > { %1237 = vst.msk [vmem:[#allocation2 + $0x8] sm:$0xff] %vm1236_vm11, %v1234_v48  ;;  %vm2244_vm11 = vcmask 257024  }
 0x187   : > { %1424 = vrot.lane.b32.xlu0 %v1233_v46, %s2610_s22 }
 0x18b   : > { %1522 = vrot.lane.b32.xlu0 %v1233_v46, %s2606_s18 }
 0x18c   : > { %v1239_v49 = vld [vmem:[#allocation2 + $0x8] sm:$0xff] }
 0x18d   : > { %1249 = vrot.lane.b32.xlu1 %v1239_v49, %s2600_s11  ;;  %1374 = vmatprep.subr.mxu0 %v1239_v49  ;;  %s2612_s11 = smov 64  }
 0x18e   : > { %1375 = vmatpush1.msra.mxu0 %v1233_v46 }
 0x18f   : > { %1619 = vrot.lane.b32.xlu0 %v1233_v46, %s2609_s20  ;;  %2486 = vmatmul.mubr.msk.f32.vlgmr.msra.gmra.mxu0 %vm1254_vm13, %v1240_v50 }
 0x190   : > { %1414 = vmatprep.mubr.f32.mxu0 %v2599_v0 }
 0x191   : > { %1426 = vrot.lane.b32.xlu1 %v1239_v49, %s2610_s22 }
 0x193   : > { %1716 = vrot.lane.b32.xlu0 %v1233_v46, %s2611_s29  ;;  %2487 = vmatmul.mubr.msk.f32.gmra.mxu0 %vm1254_vm13, %v1241_v51 }
 0x194   : > { %1599 = vmatprep.mubr.f32.mxu0 %v2599_v0 }
 0x195   : > { %1524 = vrot.lane.b32.xlu1 %v1239_v49, %s2606_s18 }
 0x197   : > { %1814 = vrot.lane.b32.xlu0 %v1233_v46, %s2612_s11 }
 0x199   : > { %1621 = vrot.lane.b32.xlu1 %v1239_v49, %s2609_s20 }
 0x19b   : > { %1912 = vrot.lane.b32.xlu0 %v1233_v46, %s2613_s30 }
 0x19d   : > { %1718 = vrot.lane.b32.xlu1 %v1239_v49, %s2611_s29 }
 0x19f   : > { %2010 = vrot.lane.b32.xlu0 %v1233_v46, %s2614_s9 }
 0x1a1   : > { %1816 = vrot.lane.b32.xlu1 %v1239_v49, %s2612_s11 }
 0x1a3   : > { %2114 = vperm.xlu0 %2551, %v2106_v53  }
 0x1a5   : > { %1914 = vrot.lane.b32.xlu1 %v1239_v49, %s2613_s30 }
 0x1a9   : > { %2012 = vrot.lane.b32.xlu1 %v1239_v49, %s2614_s9 }
 0x1ad   : > { %2109 = vperm.xlu1 %2550, %v2105_v52  }
 0x1b1   : > { %2158 = vperm.xlu1 %2550, %v2155_v54  }
 0x1f5   : > { %v1248_v55 = vpop.permute.xlu0 %1247 }
 0x1f9   : > { %v1425_v56 = vpop.permute.xlu0 %1424 }
 0x1fd   : > { %v1523_v57 = vpop.permute.xlu0 %1522 }
 0x1ff   : > { %v1250_v58 = vpop.permute.xlu1 %1249 }
 0x200   : > { %v1251_v60 = vsel %vm512_vm4, %v1248_v55, %v1250_v58  ;;  %1291 = vmatprep.subr.mxu1 %v1250_v58  ;;  %vm2146_vm4 = vcmask 261120  }
 0x201   : > { %1292 = vmatpush1.msra.mxu1 %v1251_v60  ;;  %v1620_v63 = vpop.permute.xlu0 %1619 }
 0x202   : > { %2484 = vmatmul.mubr.msk.f32.vlgmr.msra.gmra.mxu1 %vm1254_vm13, %v2482_v59 }
 0x203   : > { %v1427_v61 = vpop.permute.xlu1 %1426  ;;  %1331 = vmatprep.mubr.f32.mxu1 %v2599_v0 }
 0x204   : > { %v1429_v1 = vsel %vm1428_vm14, %v1425_v56, %v1427_v61  ;;  %1468 = vmatprep.subr.mxu1 %v1427_v61 }
 0x205   : > { %1469 = vmatpush1.msra.mxu1 %v1429_v1  ;;  %v1717_v6 = vpop.permute.xlu0 %1716 }
 0x206   : > { %2485 = vmatmul.mubr.msk.f32.gmra.mxu1 %vm1254_vm13, %v2483_v62 }
 0x207   : > { %v1525_v2 = vpop.permute.xlu1 %1524  ;;  %1502 = vmatprep.mubr.f32.mxu1 %v2599_v0 }
 0x208   : > { %v1526_v5 = vsel %vm914_vm7, %v1523_v57, %v1525_v2  ;;  %1565 = vmatprep.subr.mxu0 %v1525_v2 }
 0x209   : > { %1566 = vmatpush1.msra.mxu0 %v1526_v5  ;;  %v1815_v12 = vpop.permute.xlu0 %1814 }
 0x20a   : > { %2490 = vmatmul.mubr.msk.f32.vlgmr.msra.gmra.mxu1 %vm1254_vm13, %v2488_v3  ;;  %2494 = vmatmul.mubr.msk.f32.vlgmr.msra.gmra.mxu0 %vm1254_vm13, %v2492_v4 }
 0x20b   : > { %v1622_v7 = vpop.permute.xlu1 %1621  ;;  %1508 = vmatprep.mubr.f32.mxu1 %v2599_v0  ;;  %1605 = vmatprep.mubr.f32.mxu0 %v2599_v0 }
 0x20c   : > { %v1623_v10 = vsel %vm1132_vm9, %v1620_v63, %v1622_v7  ;;  %1662 = vmatprep.subr.mxu1 %v1622_v7  ;;  %vm2236_vm9 = vcmask 1043456  }
 0x20d   : > { %1663 = vmatpush1.msra.mxu1 %v1623_v10  ;;  %v1913_v20 = vpop.permute.xlu0 %1912 }
 0x20e   : > { %2491 = vmatmul.mubr.msk.f32.gmra.mxu1 %vm1254_vm13, %v2489_v8  ;;  %2495 = vmatmul.mubr.msk.f32.gmra.mxu0 %vm1254_vm13, %v2493_v9 }
 0x20f   : > { %v1719_v11 = vpop.permute.xlu1 %1718  ;;  %1696 = vmatprep.mubr.f32.mxu1 %v2599_v0  ;;  %1794 = vmatprep.mubr.f32.mxu0 %v2599_v0 }
 0x210   : > { %v1721_v15 = vsel %vm1720_vm15, %v1717_v6, %v1719_v11  ;;  %1760 = vmatprep.subr.mxu0 %v1719_v11 }
 0x211   : > { %1761 = vmatpush1.msra.mxu0 %v1721_v15  ;;  %v2011_v25 = vpop.permute.xlu0 %2010 }
 0x212   : > { %2498 = vmatmul.mubr.msk.f32.vlgmr.msra.gmra.mxu1 %vm1254_vm13, %v2496_v13  ;;  %2502 = vmatmul.mubr.msk.f32.vlgmr.msra.gmra.mxu0 %vm1254_vm13, %v2500_v14 }
 0x213   : > { %v1817_v16 = vpop.permute.xlu1 %1816  ;;  %1702 = vmatprep.mubr.f32.mxu1 %v2599_v0  ;;  %1800 = vmatprep.mubr.f32.mxu0 %v2599_v0 }
 0x214   : > { %v1819_v19 = vsel %vm1818_vm0, %v1815_v12, %v1817_v16  ;;  %1858 = vmatprep.subr.mxu1 %v1817_v16 }
 0x215   : > { %1859 = vmatpush1.msra.mxu1 %v1819_v19 }
 0x216   : > { %2499 = vmatmul.mubr.msk.f32.gmra.mxu1 %vm1254_vm13, %v2497_v17  ;;  %2503 = vmatmul.mubr.msk.f32.gmra.mxu0 %vm1254_vm13, %v2501_v18 }
 0x217   : > { %v1915_v21 = vpop.permute.xlu1 %1914  ;;  %1892 = vmatprep.mubr.f32.mxu1 %v2599_v0  ;;  %1990 = vmatprep.mubr.f32.mxu0 %v2599_v0 }
 0x218   : > { %v1917_v24 = vsel %vm1916_vm1, %v1913_v20, %v1915_v21  ;;  %1956 = vmatprep.subr.mxu0 %v1915_v21 }
 0x219   : > { %1957 = vmatpush1.msra.mxu0 %v1917_v24 }
 0x21a   : > { %2506 = vmatmul.mubr.msk.f32.vlgmr.msra.gmra.mxu1 %vm1254_vm13, %v2504_v22  ;;  %2510 = vmatmul.mubr.msk.f32.vlgmr.msra.gmra.mxu0 %vm1254_vm13, %v2508_v23 }
 0x21b   : > { %v2013_v26 = vpop.permute.xlu1 %2012  ;;  %1898 = vmatprep.mubr.f32.mxu1 %v2599_v0  ;;  %1996 = vmatprep.mubr.f32.mxu0 %v2599_v0 }
 0x21c   : > { %v2015_v29 = vsel %vm2014_vm2, %v2011_v25, %v2013_v26  ;;  %2054 = vmatprep.subr.mxu1 %v2013_v26 }
 0x21d   : > { %2055 = vmatpush1.msra.mxu1 %v2015_v29 }
 0x21e   : > { %2507 = vmatmul.mubr.msk.f32.gmra.mxu1 %vm1254_vm13, %v2505_v27  ;;  %2511 = vmatmul.mubr.msk.f32.gmra.mxu0 %vm1254_vm13, %v2509_v28 }
 0x21f   : > { %2088 = vmatprep.mubr.f32.mxu1 %v2599_v0  ;;  %2229 = vmatprep.mubr.f32.mxu0 %v2599_v0 }
 0x222   : > { %2514 = vmatmul.mubr.msk.f32.vlgmr.msra.gmra.mxu1 %vm1254_vm13, %v2512_v30 }
 0x223   : > { %2094 = vmatprep.mubr.f32.mxu1 %v2599_v0 }
 0x226   : > { %2515 = vmatmul.mubr.msk.f32.gmra.mxu1 %vm1254_vm13, %v2513_v31 }
 0x228   : > { %v2110_v24 = vpop.permute.xlu1 %2109 }
 0x24f   : > { %v1410_v32 = vpop.f32.mrf.mxu0 }
 0x251   : > { %v1412_v33 = vpop.f32.mrf.mxu0 }
 0x253   : > { %v1416_v36 = vpop.f32.mrf.mxu0 }
 0x255   : > { %v1418_v39 = vpop.f32.mrf.mxu0 }
 0x2c2   : > { %v1327_v34 = vpop.f32.mrf.mxu1 }
 0x2c3   : > { %v1411_v45 = vadd.f32 %v1410_v32, %v1327_v34 }
 0x2c4   : > { %v1329_v35 = vpop.f32.mrf.mxu1 }
 0x2c5   : > { %v1413_v48 = vadd.f32 %v1412_v33, %v1329_v35 }
 0x2c6   : > { %v1333_v37 = vpop.f32.mrf.mxu1 }
 0x2c7   : > { %v1417_v52 = vadd.f32 %v1416_v36, %v1333_v37 }
 0x2c8   : > { %v1335_v38 = vpop.f32.mrf.mxu1 }
 0x2c9   : > { %v1419_v56 = vadd.f32 %v1418_v39, %v1335_v38  ;;  %v2115_v38 = vpop.permute.xlu0 %2114 }
 0x2ca   : > { %v1504_v40 = vpop.f32.mrf.mxu1  ;;  %v1601_v41 = vpop.f32.mrf.mxu0 }
 0x2cb   : > { %v1515_v49 = vadd.f32 %v1504_v40, %v1411_v45 }
 0x2cc   : > { %v1506_v42 = vpop.f32.mrf.mxu1  ;;  %v1603_v43 = vpop.f32.mrf.mxu0 }
 0x2cd   : > { %v1516_v53 = vadd.f32 %v1506_v42, %v1413_v48  ;;  %v1612_v57 = vadd.f32 %v1601_v41, %v1515_v49 }
 0x2ce   : > { %v1510_v44 = vpop.f32.mrf.mxu1  ;;  %v1607_v0 = vpop.f32.mrf.mxu0 }
 0x2cf   : > { %v1517_v58 = vadd.f32 %v1510_v44, %v1417_v52  ;;  %v1613_v61 = vadd.f32 %v1603_v43, %v1516_v53 }
 0x2d0   : > { %v1512_v46 = vpop.f32.mrf.mxu1  ;;  %v1609_v47 = vpop.f32.mrf.mxu0 }
 0x2d1   : > { %v1518_v62 = vadd.f32 %v1512_v46, %v1419_v56  ;;  %v1614_v3 = vadd.f32 %v1607_v0, %v1517_v58 }
 0x2d2   : > { %v1698_v50 = vpop.f32.mrf.mxu1  ;;  %v1796_v51 = vpop.f32.mrf.mxu0 }
 0x2d3   : > { %v1709_v63 = vadd.f32 %v1698_v50, %v1612_v57  ;;  %v1615_v7 = vadd.f32 %v1609_v47, %v1518_v62 }
 0x2d4   : > { %v1700_v54 = vpop.f32.mrf.mxu1  ;;  %v1798_v55 = vpop.f32.mrf.mxu0 }
 0x2d5   : > { %v1710_v4 = vadd.f32 %v1700_v54, %v1613_v61  ;;  %v1807_v8 = vadd.f32 %v1796_v51, %v1709_v63  ;;  %v2154_v63 = vld [vmem:[%s2916_s5] sm:$0xff] }
 0x2d6   : > { %v1704_v59 = vpop.f32.mrf.mxu1  ;;  %v1802_v60 = vpop.f32.mrf.mxu0 }
 0x2d7   : > { %v1711_v9 = vadd.f32 %v1704_v59, %v1614_v3  ;;  %v1808_v12 = vadd.f32 %v1798_v55, %v1710_v4 }
 0x2d8   : > { %v1706_v1 = vpop.f32.mrf.mxu1  ;;  %v1804_v2 = vpop.f32.mrf.mxu0 }
 0x2d9   : > { %v1712_v13 = vadd.f32 %v1706_v1, %v1615_v7  ;;  %v1809_v16 = vadd.f32 %v1802_v60, %v1711_v9  ;;  %v2159_v1 = vpop.permute.xlu1 %2158 }
 0x2da   : > { %v1894_v5 = vpop.f32.mrf.mxu1  ;;  %v1992_v6 = vpop.f32.mrf.mxu0 }
 0x2db   : > { %v1905_v14 = vadd.f32 %v1894_v5, %v1807_v8  ;;  %v1810_v20 = vadd.f32 %v1804_v2, %v1712_v13 }
 0x2dc   : > { %v1896_v10 = vpop.f32.mrf.mxu1  ;;  %v1994_v11 = vpop.f32.mrf.mxu0 }
 0x2dd   : > { %v1906_v17 = vadd.f32 %v1896_v10, %v1808_v12  ;;  %v2003_v21 = vadd.f32 %v1992_v6, %v1905_v14 }
 0x2de   : > { %v1900_v15 = vpop.f32.mrf.mxu1  ;;  %v1998_v19 = vpop.f32.mrf.mxu0 }
 0x2df   : > { %v1907_v22 = vadd.f32 %v1900_v15, %v1809_v16  ;;  %v2004_v25 = vadd.f32 %v1994_v11, %v1906_v17 }
 0x2e0   : > { %v1902_v18 = vpop.f32.mrf.mxu1  ;;  %v2000_v28 = vpop.f32.mrf.mxu0 }
 0x2e1   : > { %v1908_v26 = vadd.f32 %v1902_v18, %v1810_v20  ;;  %v2005_v30 = vadd.f32 %v1998_v19, %v1907_v22 }
 0x2e2   : > { %v2090_v23 = vpop.f32.mrf.mxu1 }
 0x2e3   : > { %v2101_v27 = vadd.f32 %v2090_v23, %v2003_v21  ;;  %v2006_v34 = vadd.f32 %v2000_v28, %v1908_v26 }
 0x2e4   : > { %v2092_v29 = vpop.f32.mrf.mxu1 }
 0x2e5   : > { %v2117_v31 = vadd.f32 %v2110_v24, %v2101_v27  ;;  %v2102_v32 = vadd.f32 %v2092_v29, %v2004_v25 }
 0x2e6   : > { %v2096_v33 = vpop.f32.mrf.mxu1 }
 0x2e7   : > { %v2125_v35 = vmin.f32 %v2117_v31, 0.0  ;;  %v2118_v36 = vadd.f32 %v2110_v24, %v2102_v32  ;;  %v2103_v37 = vadd.f32 %v2096_v33, %v2005_v30  ;;  %vm2121_vm3 = vcmp.gt.f32.partialorder %v2117_v31, 0.0 }
 0x2e8   : > { %v2098_v39 = vpop.f32.mrf.mxu1 }
 0x2e9   : > { %v2129_v40 = vmul.f32 1.442695, %v2125_v35  ;;  %v2126_v41 = vmin.f32 %v2118_v36, 0.0  ;;  %v2104_v42 = vadd.f32 %v2098_v39, %v2006_v34  ;;  %v2119_v43 = vadd.f32 %v2115_v38, %v2103_v37 }
 0x2ea   : > { %vm2122_vm5 = vcmp.gt.f32.partialorder %v2118_v36, 0.0 }
 0x2eb   : > { %2559 = vpow2.f32 %v2129_v40  ;;  %v2131_v44 = vmul.f32 1.442695, %v2126_v41  ;;  %v2120_v0 = vadd.f32 %v2115_v38, %v2104_v42  ;;  %v2127_v45 = vmin.f32 %v2119_v43, 0.0 }
 0x2ec   : > { %vm2123_vm6 = vcmp.gt.f32.partialorder %v2119_v43, 0.0 }
 0x2ed   : > { %2561 = vpow2.f32 %v2131_v44  ;;  %v2128_v46 = vmin.f32 %v2120_v0, 0.0  ;;  %v2133_v47 = vmul.f32 1.442695, %v2127_v45  ;;  %vm2124_vm7 = vcmp.gt.f32.partialorder %v2120_v0, 0.0 }
 0x2ef   : > { %v2135_v48 = vmul.f32 1.442695, %v2128_v46  ;;  %2563 = vpow2.f32 %v2133_v47 }
 0x2f1   : > { %2565 = vpow2.f32 %v2135_v48 }
 0x2f8   : > { %v2560_v49 = vpop.eup %2559 }
 0x2f9   : > { %v2516_v50 = vadd.f32 -1.0, %v2560_v49 }
 0x2fa   : > { %v2562_v51 = vpop.eup %2561 }
 0x2fb   : > { %v2141_v52 = vsel %vm2121_vm3, %v2117_v31, %v2516_v50  ;;  %v2517_v53 = vadd.f32 -1.0, %v2562_v51 }
 0x2fc   : > { %v2564_v54 = vpop.eup %2563 }
 0x2fd   : > { %v2142_v55 = vsel %vm2122_vm5, %v2118_v36, %v2517_v53  ;;  %v2518_v57 = vadd.f32 -1.0, %v2564_v54 }
 0x2fe   : > { %v2566_v56 = vpop.eup %2565  ;;  %2147 = vst.msk [vmem:[#allocation3 + $0x8] sm:$0xff] %vm2146_vm4, %v2142_v55 }
 0x2ff   : > { %v2519_v58 = vadd.f32 -1.0, %v2566_v56  ;;  %v2143_v59 = vsel %vm2123_vm6, %v2119_v43, %v2518_v57 }
 0x301   : > { %v2144_v60 = vsel %vm2124_vm7, %v2120_v0, %v2519_v58 }
 0x302   : > { %2149 = vst.msk [vmem:[#allocation3 + $0x18] sm:$0xff] %vm2146_vm4, %v2144_v60 }
 0x305   : > { %v2151_v62 = vld [vmem:[#allocation3 + $0x8] sm:$0xff] }
 0x309   : > { %v2153_v61 = vld [vmem:[#allocation3 + $0x18] sm:$0xff] }
 0x30a   : > { %2193 = vmatprep.subr.mxu0 %v2153_v61 }
 0x30b   : > { %2194 = vmatpush1.msra.mxu0 %v2143_v59 }
 0x30c   : > { %2195 = vmatprep.subr.mxu0 %v2151_v62 }
 0x30d   : > { %2196 = vmatpush1.msra.mxu0 %v2141_v52 }
 0x30e   : > { %2520 = vmatmul.mubr.msk.f32.vlgmr.msra.gmra.mxu0 %vm2161_vm8, %v2154_v63 }
 0x3ce   : > { %v2231_v2 = vpop.f32.mrf.mxu0 }
 0x3cf   : > { %v2232_v3 = vadd.f32 %v2231_v2, %v2159_v1 }
 0x3d0   : > { %v2233_v4 = vpop.f32.mrf.mxu0 }
 0x3d1   : > { %v2237_v5 = vsel %vm2236_vm9, %v2232_v3, -inf  ;;  %v2283_v6 = vsel %vm2282_vm10, %v2232_v3, -inf  ;;  %v2234_v7 = vadd.f32 %v2233_v4, %v2159_v1 }
 0x3d2   : > { %v2238_v8 = vrot.slane %v2237_v5, 4  ;;  %v2284_v9 = vrot.slane %v2283_v6, 4 }
 0x3d3   : > { %v2245_v10 = vsel %vm2244_vm11, %v2234_v7, -inf  ;;  %v2291_v11 = vsel %vm2290_vm12, %v2234_v7, -inf }
 0x3d4   : > { %v2239_v12 = vmax.f32 %v2237_v5, %v2238_v8  ;;  %v2285_v13 = vmax.f32 %v2283_v6, %v2284_v9  ;;  %v2246_v14 = vrot.slane %v2245_v10, 4  ;;  %v2292_v15 = vrot.slane %v2291_v11, 4 }
 0x3d6   : > { %v2240_v16 = vrot.slane %v2239_v12, 2  ;;  %v2286_v17 = vrot.slane %v2285_v13, 2  ;;  %v2247_v18 = vmax.f32 %v2245_v10, %v2246_v14  ;;  %v2293_v19 = vmax.f32 %v2291_v11, %v2292_v15 }
 0x3d8   : > { %v2241_v20 = vmax.f32 %v2239_v12, %v2240_v16  ;;  %v2287_v21 = vmax.f32 %v2285_v13, %v2286_v17  ;;  %v2248_v22 = vrot.slane %v2247_v18, 2  ;;  %v2294_v23 = vrot.slane %v2293_v19, 2 }
 0x3da   : > { %v2242_v24 = vrot.slane %v2241_v20, 1  ;;  %v2288_v25 = vrot.slane %v2287_v21, 1  ;;  %v2249_v26 = vmax.f32 %v2247_v18, %v2248_v22  ;;  %v2295_v27 = vmax.f32 %v2293_v19, %v2294_v23 }
 0x3dc   : > { %v2243_v28 = vmax.f32 %v2241_v20, %v2242_v24  ;;  %v2289_v29 = vmax.f32 %v2287_v21, %v2288_v25  ;;  %v2250_v30 = vrot.slane %v2249_v26, 1  ;;  %v2296_v31 = vrot.slane %v2295_v27, 1 }
 0x3de   : > { %v2875_v32 = vsub.f32 %v2232_v3, %v2243_v28  ;;  %v2877_v33 = vsub.f32 %v2232_v3, %v2289_v29  ;;  %v2251_v34 = vmax.f32 %v2249_v26, %v2250_v30  ;;  %v2297_v35 = vmax.f32 %v2295_v27, %v2296_v31 }
 0x3e0   : > { %v2254_v36 = vmul.f32 1.442695, %v2875_v32  ;;  %v2300_v37 = vmul.f32 1.442695, %v2877_v33  ;;  %v2881_v38 = vsub.f32 %v2234_v7, %v2251_v34  ;;  %v2883_v39 = vsub.f32 %v2234_v7, %v2297_v35 }
 0x3e2   : > { %2567 = vpow2.f32 %v2254_v36  ;;  %v2256_v40 = vmul.f32 1.442695, %v2881_v38  ;;  %v2302_v41 = vmul.f32 1.442695, %v2883_v39 }
 0x3e3   : > { %2569 = vpow2.f32 %v2300_v37 }
 0x3e4   : > { %2571 = vpow2.f32 %v2256_v40 }
 0x3e5   : > { %2573 = vpow2.f32 %v2302_v41 }
 0x3ef   : > { %v2568_v42 = vpop.eup %2567 }
 0x3f0   : > { %v2570_v43 = vpop.eup %2569  ;;  %v2258_v44 = vsel %vm2236_vm9, %v2568_v42, 0.0 }
 0x3f1   : > { %v2572_v0 = vpop.eup %2571  ;;  %v2259_v45 = vrot.slane %v2258_v44, 4  ;;  %v2306_v46 = vrot.slane %v2570_v43, 4 }
 0x3f2   : > { %v2574_v47 = vpop.eup %2573  ;;  %v2265_v48 = vsel %vm2244_vm11, %v2572_v0, 0.0 }
 0x3f3   : > { %v2260_v49 = vadd.f32 %v2259_v45, %v2258_v44  ;;  %v2310_v50 = vsel %vm2236_vm9, %v2306_v46, 0.0  ;;  %v2266_v51 = vrot.slane %v2265_v48, 4  ;;  %v2307_v52 = vrot.slane %v2574_v47, 4 }
 0x3f4   : > { %v2311_v53 = vrot.slane %v2310_v50, 4 }
 0x3f5   : > { %v2261_v54 = vrot.slane %v2260_v49, 2  ;;  %v2267_v55 = vadd.f32 %v2266_v51, %v2265_v48  ;;  %v2317_v56 = vsel %vm2244_vm11, %v2307_v52, 0.0 }
 0x3f6   : > { %v2312_v57 = vadd.f32 %v2311_v53, %v2310_v50  ;;  %v2318_v58 = vrot.slane %v2317_v56, 4 }
 0x3f7   : > { %v2262_v59 = vadd.f32 %v2261_v54, %v2260_v49  ;;  %v2268_v60 = vrot.slane %v2267_v55, 2 }
 0x3f8   : > { %v2313_v61 = vrot.slane %v2312_v57, 2  ;;  %v2319_v62 = vadd.f32 %v2318_v58, %v2317_v56 }
 0x3f9   : > { %v2263_v63 = vrot.slane %v2262_v59, 1  ;;  %v2269_v1 = vadd.f32 %v2268_v60, %v2267_v55 }
 0x3fa   : > { %v2314_v2 = vadd.f32 %v2313_v61, %v2312_v57  ;;  %v2320_v3 = vrot.slane %v2319_v62, 2 }
 0x3fb   : > { %v2264_v4 = vadd.f32 %v2263_v63, %v2262_v59  ;;  %v2270_v5 = vrot.slane %v2269_v1, 1 }
 0x3fc   : > { %v2315_v6 = vrot.slane %v2314_v2, 1  ;;  %v2321_v7 = vadd.f32 %v2320_v3, %v2319_v62 }
 0x3fd   : > { %2575 = vrcp.f32 %v2264_v4  ;;  %v2271_v8 = vadd.f32 %v2270_v5, %v2269_v1 }
 0x3fe   : > { %2577 = vlog2.f32 %v2264_v4  ;;  %v2316_v9 = vadd.f32 %v2315_v6, %v2314_v2  ;;  %v2322_v10 = vrot.slane %v2321_v7, 1 }
 0x3ff   : > { %2579 = vrcp.f32 %v2271_v8 }
 0x400   : > { %2581 = vrcp.f32 %v2316_v9  ;;  %v2323_v11 = vadd.f32 %v2322_v10, %v2321_v7 }
 0x401   : > { %2583 = vlog2.f32 %v2316_v9 }
 0x402   : > { %2585 = vlog2.f32 %v2271_v8 }
 0x403   : > { %2587 = vrcp.f32 %v2323_v11 }
 0x404   : > { %2589 = vlog2.f32 %v2323_v11 }
 0x40a   : > { %v2576_v12 = vpop.eup %2575 }
 0x40b   : > { %v2578_v13 = vpop.eup %2577  ;;  %v2274_v18 = vmul.f32 %v2576_v12, %v2568_v42 }
 0x40c   : > { %v2580_v14 = vpop.eup %2579  ;;  %v2277_v16 = vmul.f32 0.6931472, %v2578_v13 }
 0x40d   : > { %v2582_v15 = vpop.eup %2581  ;;  %v2275_v28 = vmul.f32 %v2580_v14, %v2572_v0 }
 0x40e   : > { %v2584_v17 = vpop.eup %2583  ;;  %v2326_v19 = vmul.f32 %v2582_v15, %v2570_v43  ;;  %v2280_v26 = vsub.f32 %v2875_v32, %v2277_v16 }
 0x40f   : > { %v2586_v20 = vpop.eup %2585  ;;  %v2329_v21 = vmul.f32 0.6931472, %v2584_v17 }
 0x410   : > { %v2588_v22 = vpop.eup %2587  ;;  %v2334_v23 = vsel %vm2236_vm9, %v2274_v18, %v2326_v19  ;;  %v2279_v24 = vmul.f32 0.6931472, %v2586_v20 }
 0x411   : > { %v2590_v25 = vpop.eup %2589  ;;  %v2332_v27 = vsub.f32 %v2877_v33, %v2329_v21  ;;  %2336 = vst [vmem:[%s313_s14] sm:$0xff] %v2334_v23  ;;  %v2327_v29 = vmul.f32 %v2588_v22, %v2574_v47 }
 0x412   : > { %v2331_v30 = vmul.f32 0.6931472, %v2590_v25  ;;  %v2281_v35 = vsub.f32 %v2881_v38, %v2279_v24 }
 0x413   : > { %v2338_v31 = vsel %vm2236_vm9, %v2280_v26, %v2332_v27  ;;  %v2335_v34 = vsel %vm2236_vm9, %v2275_v28, %v2327_v29 }
 0x414   : > { %2340 = vst [vmem:[%s318_s28] sm:$0xff] %v2338_v31  ;;  %v2333_v36 = vsub.f32 %v2883_v39, %v2331_v30  ;;  %2337 = vst.msk [vmem:[%s313_s14 + $0x8] sm:$0xff] %vm2146_vm4, %v2335_v34 }
 0x416   : > { %v2339_v37 = vsel %vm2236_vm9, %v2281_v35, %v2333_v36 }
 0x417   : > { %2341 = vst.msk [vmem:[%s318_s28 + $0x8] sm:$0xff] %vm2146_vm4, %v2339_v37 }
 0x418 PF: > { %s19_s27 = sadd.s32 1, %s2597_s27  }
 0x419   : > { %p16_p4 = scmp.ge.s32.totalorder %s19_s27, 4  }
 0x41b   :  { %18 = sbr.rel (!%p16_p4) target bundleno = 1 (0x1), region = 106 }

</bundles_post_ra>
